<compile_context>
chip_gen: v7x
topology: tpu7x:2x2x1
jax: 0.10.0
libtpu: 0.0.40
codegen_flags: <defaults>
</compile_context>

<pallas_src>
import functools
import math

import jax
import jax.numpy as jnp
from jax import lax
from jax.experimental import pallas as pl
from jax.experimental.pallas import tpu as pltpu

# ----- cfg.coarse_loss constants (GeoTransformer defaults) -----
POS_MARGIN = 0.1
NEG_MARGIN = 1.4
POS_OPTIMAL = 0.1
NEG_OPTIMAL = 1.4
LOG_SCALE = 24.0
POSITIVE_OVERLAP = 0.1

# Static logsumexp shift.  Do NOT use 0: pos logits reach ~86.6 and exp(86.6)
# summed over many rows overflows f32.  44 keeps exp(max-44) ~ 3e18 (safe when
# summed) and exp(0-44) ~ 7.8e-20 (far from f32 denormal flush).
SHIFT = 44.0
EXP_NEG_SHIFT = math.exp(-SHIFT)

_NUM_CORES = 2  # v7x TensorCore split factor (plain sequential loop on v5e/v6e)


def _round_up(x, m):
    return (x + m - 1) // m * m


def _softplus(x):
    # numerically-stable softplus: max(x, 0) + log(1 + exp(-|x|)); maps -inf -> 0
    return jnp.maximum(x, 0.0) + jnp.log(1.0 + jnp.exp(-jnp.abs(x)))


def _coarse_matching_loss_kernel(ref_ref, src_ref, ovl_ref, out_ref, *,
                                 n_valid, m_valid, tile_n, tiles_per_core):
    core = pl.program_id(0)      # "parallel" axis (split across TCs on v7x)
    step = pl.program_id(1)      # "arbitrary" axis carrying the accumulators

    @pl.when(step == 0)
    def _init():
        out_ref[...] = jnp.zeros_like(out_ref)

    ref = ref_ref[...]                           # (tile_n, C_pad) f32
    src = src_ref[...]                           # (M_pad,  C_pad) f32, resident
    ovl = ovl_ref[...].astype(jnp.float32)       # (tile_n, M_pad) signed-sqrt enc.
    m_pad = ovl.shape[1]

    # validity masks for zero-padded rows / columns
    row0 = (core * tiles_per_core + step) * tile_n
    row_ids = row0 + lax.broadcasted_iota(jnp.int32, (tile_n, 1), 0)
    col_ids = lax.broadcasted_iota(jnp.int32, (1, m_pad), 1)
    valid = jnp.logical_and(row_ids < n_valid, col_ids < m_valid)
    valid_f = valid.astype(jnp.float32)

    # pairwise_distance(ref, src, normalized=True) = sqrt(relu(2 - 2 ref @ src^T))
    xy = lax.dot_general(ref, src, (((1,), (1,)), ((), ())),
                         preferred_element_type=jnp.float32)   # (tile_n, M_pad)
    d = jnp.sqrt(jnp.maximum(2.0 - 2.0 * xy, 0.0))

    # signed-sqrt encoding: +sqrt(o) if o > POSITIVE_OVERLAP,
    #                       -sqrt(o) if 0 < o <= POSITIVE_OVERLAP, 0 otherwise
    pos_masks = ovl > 0.0                                   # padding is all-zero
    neg_masks = jnp.logical_and(ovl == 0.0, valid)
    pos_f = pos_masks.astype(jnp.float32)
    neg_f = neg_masks.astype(jnp.float32)
    pos_scales = jnp.maximum(ovl, 0.0)          # sqrt(overlap) on positives only

    # merged circle-loss logits: pos_w / neg_w are disjointly non-zero, so one
    # plane (and ONE exp) carries both; elements that are neither keep logit 0.
    pos_w = jnp.maximum(d - POS_OPTIMAL, 0.0) * pos_scales
    neg_w = jnp.maximum(NEG_OPTIMAL - d, 0.0) * neg_f
    logits = LOG_SCALE * ((d - POS_MARGIN) * pos_w + (NEG_MARGIN - d) * neg_w)

    e_all = jnp.exp(logits - SHIFT)                         # single big exp
    e_dflt = EXP_NEG_SHIFT * valid_f                        # exp(0 - SHIFT), masked
    e_pos = jnp.where(pos_masks, e_all, e_dflt)
    e_neg = jnp.where(neg_masks, e_all, e_dflt)

    # ---- row direction: finished per tile (static-shift logsumexp) ----
    lse_row = (2.0 * SHIFT
               + jnp.log(jnp.sum(e_pos, axis=-1, keepdims=True))
               + jnp.log(jnp.sum(e_neg, axis=-1, keepdims=True)))      # (tile_n, 1)
    loss_row = _softplus(lse_row) * (1.0 / LOG_SCALE)
    row_ok_f = jnp.logical_and(
        jnp.sum(pos_f, axis=-1, keepdims=True) > 0.0,
        jnp.sum(neg_f, axis=-1, keepdims=True) > 0.0).astype(jnp.float32)
    tile_row_sum = jnp.sum(loss_row * row_ok_f)
    tile_row_cnt = jnp.sum(row_ok_f)

    # ---- packed per-core statistics: one full (8, M_pad) block add per step ----
    # rows: 0 col e_pos sum, 1 col e_neg sum, 2 col pos count, 3 col neg count,
    #       4 row-loss sum (broadcast), 5 row count (broadcast), 6-7 unused.
    sub = lax.broadcasted_iota(jnp.int32, (8, m_pad), 0)
    upd = jnp.where(sub == 0, jnp.sum(e_pos, axis=0, keepdims=True),
          jnp.where(sub == 1, jnp.sum(e_neg, axis=0, keepdims=True),
          jnp.where(sub == 2, jnp.sum(pos_f, axis=0, keepdims=True),
          jnp.where(sub == 3, jnp.sum(neg_f, axis=0, keepdims=True),
          jnp.where(sub == 4, tile_row_sum,
          jnp.where(sub == 5, tile_row_cnt, 0.0))))))
    out_ref[...] += upd.reshape(1, 8, m_pad)


def _choose_tile_n(n, m_pad, c_pad):
    # Budget sized for v7x (64 MiB physical / TC, 32 MiB scoped default):
    # subtract the double-buffered resident src block and the output block,
    # then charge each tile row for ~10 live f32 (1, M_pad) temporaries plus
    # its double-buffered ref (f32) and ovl (bf16) pipeline slices.
    budget = 24 * 1024 * 1024
    fixed = 2 * m_pad * c_pad * 4 + 2 * 8 * m_pad * 4
    per_row = 10 * m_pad * 4 + 2 * c_pad * 4 + 2 * m_pad * 2
    avail = max(budget - fixed, 16 * per_row)
    t = avail // per_row
    t = max(16, min(512, (t // 16) * 16))
    return int(min(t, _round_up(n, 16)))


def coarse_matching_loss(ref_feats, src_feats, gt_node_corr_indices,
                         gt_node_corr_overlaps, *, tile_n=None):
    """JAX/Pallas equivalent of CoarseMatchingLoss.forward (returns a scalar)."""
    ref_feats = jnp.asarray(ref_feats, jnp.float32)
    src_feats = jnp.asarray(src_feats, jnp.float32)
    n, c = ref_feats.shape
    m = src_feats.shape[0]

    c_pad = _round_up(c, 128)
    m_pad = _round_up(m, 128)
    if tile_n is None:
        tile_n = _choose_tile_n(n, m_pad, c_pad)
    tile_n = max(16, _round_up(int(tile_n), 16))        # bf16 plane: 16-sublane tiles
    n_pad = _round_up(n, _NUM_CORES * tile_n)
    tiles_per_core = n_pad // (_NUM_CORES * tile_n)

    # feats stay f32 into the MXU (matmul is not the binding unit; bf16 feats
    # would cost ~1e-2 relative error on small feat_dists).
    ref_p = jnp.pad(ref_feats, ((0, n_pad - n), (0, c_pad - c)))
    src_p = jnp.pad(src_feats, ((0, m_pad - m), (0, c_pad - c)))

    # glue: scatter gt correspondences straight into the padded (n_pad, m_pad)
    # plane as a bf16 signed-sqrt encoding (no separate pad copy, half the bytes;
    # exact zeros are preserved so the in-kernel ==0 / >0 masks are unchanged).
    gt_o = gt_node_corr_overlaps.astype(jnp.float32)
    enc = (jnp.where(gt_o > POSITIVE_OVERLAP, 1.0, -1.0) * jnp.sqrt(gt_o)
           ).astype(jnp.bfloat16)
    ovl_p = jnp.zeros((n_pad, m_pad), jnp.bfloat16).at[
        gt_node_corr_indices[:, 0], gt_node_corr_indices[:, 1]].set(enc)

    kernel = functools.partial(_coarse_matching_loss_kernel,
                               n_valid=n, m_valid=m, tile_n=tile_n,
                               tiles_per_core=tiles_per_core)

    grid_spec = pltpu.PrefetchScalarGridSpec(
        num_scalar_prefetch=0,
        grid=(_NUM_CORES, tiles_per_core),
        in_specs=[
            pl.BlockSpec((tile_n, c_pad),
                         lambda cc, t: (cc * tiles_per_core + t, 0)),   # ref tile
            pl.BlockSpec((m_pad, c_pad), lambda cc, t: (0, 0)),         # src, resident
            pl.BlockSpec((tile_n, m_pad),
                         lambda cc, t: (cc * tiles_per_core + t, 0)),   # ovl tile (bf16)
        ],
        out_specs=pl.BlockSpec((1, 8, m_pad), lambda cc, t: (cc, 0, 0)),
    )

    stats = pl.pallas_call(
        kernel,
        out_shape=jax.ShapeDtypeStruct((_NUM_CORES, 8, m_pad), jnp.float32),
        grid_spec=grid_spec,
        compiler_params=pltpu.CompilerParams(
            dimension_semantics=("parallel", "arbitrary"),
            vmem_limit_bytes=40 * 1024 * 1024,
        ),
    )(ref_p, src_p, ovl_p)

    # glue: combine the per-core partials; finish column logsumexp + both means.
    s = stats.sum(axis=0)                                  # (8, m_pad)
    col_s_pos, col_s_neg = s[0, :m], s[1, :m]
    col_npos, col_nneg = s[2, :m], s[3, :m]
    lse_col = 2.0 * SHIFT + jnp.log(col_s_pos) + jnp.log(col_s_neg)
    loss_col = jax.nn.softplus(lse_col) * (1.0 / LOG_SCALE)
    col_ok = jnp.logical_and(col_npos > 0.0, col_nneg > 0.0).astype(jnp.float32)
    col_mean = jnp.sum(loss_col * col_ok) / jnp.sum(col_ok)
    row_mean = s[4, 0] / s[5, 0]
    # NOTE: like the PyTorch reference, this is NaN if no row (or column) has
    # both a positive and a negative; intentionally left unguarded.
    return 0.5 * (row_mean + col_mean)


def coarse_matching_loss_ref(ref_feats, src_feats, gt_node_corr_indices,
                             gt_node_corr_overlaps):
    """Pure-JAX reference (mirrors the PyTorch semantics) for validation."""
    n, _ = ref_feats.shape
    m = src_feats.shape[0]
    overlaps = jnp.zeros((n, m), jnp.float32).at[
        gt_node_corr_indices[:, 0], gt_node_corr_indices[:, 1]
    ].set(gt_node_corr_overlaps.astype(jnp.float32))

    feat_dists = jnp.sqrt(jnp.maximum(2.0 - 2.0 * ref_feats @ src_feats.T, 0.0))
    pos_masks = overlaps > POSITIVE_OVERLAP
    neg_masks = overlaps == 0.0
    pos_scales = jnp.sqrt(overlaps * pos_masks.astype(jnp.float32))

    pos_w = jnp.maximum(feat_dists - 1e5 * (~pos_masks) - POS_OPTIMAL, 0.0) * pos_scales
    neg_w = jnp.maximum(NEG_OPTIMAL - (feat_dists + 1e5 * (~neg_masks)), 0.0)

    pos_logits = LOG_SCALE * (feat_dists - POS_MARGIN) * pos_w
    neg_logits = LOG_SCALE * (NEG_MARGIN - feat_dists) * neg_w

    lse = jax.nn.logsumexp
    loss_row = jax.nn.softplus(lse(pos_logits, -1) + lse(neg_logits, -1)) / LOG_SCALE
    loss_col = jax.nn.softplus(lse(pos_logits, -2) + lse(neg_logits, -2)) / LOG_SCALE

    row_m = (pos_masks.sum(-1) > 0) & (neg_masks.sum(-1) > 0)
    col_m = (pos_masks.sum(-2) > 0) & (neg_masks.sum(-2) > 0)
    row_mean = jnp.sum(loss_row * row_m) / jnp.sum(row_m)
    col_mean = jnp.sum(loss_col * col_m) / jnp.sum(col_m)
    return 0.5 * (row_mean + col_mean)


if __name__ == "__main__":
    key = jax.random.PRNGKey(0)
    k1, k2, k3, k4 = jax.random.split(key, 4)

    # ref nodes, src nodes, feature dim, gt correspondences (deliberately
    # unaligned so the padding / masking / multi-step paths are exercised)
    N, M, C, K = 45, 28, 32, 60

    ref_feats = jax.random.normal(k1, (N, C), dtype=jnp.float32)
    ref_feats = ref_feats / jnp.linalg.norm(ref_feats, axis=-1, keepdims=True)
    src_feats = jax.random.normal(k2, (M, C), dtype=jnp.float32)
    src_feats = src_feats / jnp.linalg.norm(src_feats, axis=-1, keepdims=True)

    # K unique (ref, src) correspondence pairs with overlaps in (0.05, 1.0)
    flat_idx = jax.random.choice(k3, N * M, shape=(K,), replace=False)
    gt_node_corr_indices = jnp.stack([flat_idx // M, flat_idx % M], axis=1).astype(jnp.int32)
    gt_node_corr_overlaps = jax.random.uniform(k4, (K,), minval=0.05, maxval=1.0,
                                               dtype=jnp.float32)

    loss_ref = coarse_matching_loss_ref(ref_feats, src_feats,
                                        gt_node_corr_indices, gt_node_corr_overlaps)

    # auto tile (one step per core) and forced small tile (multi-step accumulation)
    # tolerance 2e-3: bf16 signed-sqrt overlap encoding adds <=2^-9 relative
    # error on pos_scales; everything else is f32.
    for tn in (None, 16):
        loss = coarse_matching_loss(ref_feats, src_feats,
                                    gt_node_corr_indices, gt_node_corr_overlaps,
                                    tile_n=tn)
        loss = jax.block_until_ready(loss)
        assert jnp.allclose(loss, loss_ref, rtol=2e-3, atol=2e-3), (tn, loss, loss_ref)

    print("KERNEL_OK")
</pallas_src>

<mosaic_0001>
module attributes {stable_mosaic.version = 11 : i64} {
  func.func @_coarse_matching_loss_kernel(%arg0: i32, %arg1: i32, %arg2: memref<48x128xf32, #tpu.memory_space<vmem>>, %arg3: memref<128x128xf32, #tpu.memory_space<vmem>>, %arg4: memref<48x128xbf16, #tpu.memory_space<vmem>>, %arg5: memref<1x8x128xf32, #tpu.memory_space<vmem>>) attributes {dimension_semantics = [#tpu.dimension_semantics<parallel>, #tpu.dimension_semantics<arbitrary>], iteration_bounds = array<i64: 2, 1>, scalar_prefetch = 0 : i64, scratch_operands = 0 : i64, tpu.core_type = #tpu.core_type<tc>, window_params = [{transform_indices = @transform_0, window_bounds = array<i64: 48, 128>}, {pipeline_mode = #tpu.pipeline_mode<synchronous>, transform_indices = @transform_1, window_bounds = array<i64: 128, 128>}, {transform_indices = @transform_2, window_bounds = array<i64: 48, 128>}, {transform_indices = @transform_3, window_bounds = array<i64: 1, 8, 128>}]} {
    %c0_i32 = arith.constant 0 : i32
    %0 = arith.cmpi eq, %arg1, %c0_i32 : i32
    %1 = arith.extui %0 : i1 to i32
    %c0_i32_0 = arith.constant 0 : i32
    %2 = arith.cmpi ne, %1, %c0_i32_0 : i32
    scf.if %2 {
      %cst_47 = arith.constant 0.000000e+00 : f32
      %151 = vector.broadcast %cst_47 : f32 to vector<1x8x128xf32>
      %c0_48 = arith.constant 0 : index
      %c0_49 = arith.constant 0 : index
      %c0_50 = arith.constant 0 : index
      %152 = vector.load %arg5[%c0_48, %c0_49, %c0_50] : memref<1x8x128xf32, #tpu.memory_space<vmem>>, vector<1x8x128xf32>
      tpu.vector_store %arg5[%c0_48, %c0_49, %c0_50], %151 {strides = array<i32>} : memref<1x8x128xf32, #tpu.memory_space<vmem>>, vector<1x8x128xf32>,
    } else {
    }
    %c0 = arith.constant 0 : index
    %c0_1 = arith.constant 0 : index
    %3 = vector.load %arg2[%c0, %c0_1] : memref<48x128xf32, #tpu.memory_space<vmem>>, vector<48x128xf32>
    %c0_2 = arith.constant 0 : index
    %c0_3 = arith.constant 0 : index
    %4 = vector.load %arg3[%c0_2, %c0_3] : memref<128x128xf32, #tpu.memory_space<vmem>>, vector<128x128xf32>
    %c0_4 = arith.constant 0 : index
    %c0_5 = arith.constant 0 : index
    %5 = vector.load %arg4[%c0_4, %c0_5] : memref<48x128xbf16, #tpu.memory_space<vmem>>, vector<48x128xbf16>
    %6 = arith.extf %5 : vector<48x128xbf16> to vector<48x128xf32>
    %c1_i32 = arith.constant 1 : i32
    %7 = arith.muli %arg0, %c1_i32 : i32
    %8 = arith.addi %7, %arg1 : i32
    %c48_i32 = arith.constant 48 : i32
    %9 = arith.muli %8, %c48_i32 : i32
    %10 = tpu.iota {dimensions = array<i32: 0>} : vector<48x1xi32>
    %11 = vector.broadcast %9 : i32 to vector<48x1xi32>
    %12 = arith.addi %11, %10 : vector<48x1xi32>
    %13 = tpu.iota {dimensions = array<i32: 1>} : vector<1x128xi32>
    %c45_i32 = arith.constant 45 : i32
    %14 = vector.broadcast %c45_i32 : i32 to vector<48x1xi32>
    %15 = arith.cmpi slt, %12, %14 : vector<48x1xi32>
    %c28_i32 = arith.constant 28 : i32
    %16 = vector.broadcast %c28_i32 : i32 to vector<1x128xi32>
    %17 = arith.cmpi slt, %13, %16 : vector<1x128xi32>
    %18 = vector.broadcast %15 : vector<48x1xi1> to vector<48x128xi1>
    %19 = vector.broadcast %17 : vector<1x128xi1> to vector<48x128xi1>
    %20 = arith.andi %18, %19 : vector<48x128xi1>
    %21 = arith.extui %20 : vector<48x128xi1> to vector<48x128xi32>
    %22 = arith.sitofp %21 : vector<48x128xi32> to vector<48x128xf32>
    %cst = arith.constant dense<0.000000e+00> : vector<48x128xf32>
    %23 = tpu.matmul %3, %4, %cst {dimension_numbers = #tpu.dot_dimension_numbers<[1], [1], [0], [0], [0, 0, 1, 0], [], []>} : vector<48x128xf32>, vector<128x128xf32>, vector<48x128xf32> -> vector<48x128xf32>
    %cst_6 = arith.constant 2.000000e+00 : f32
    %24 = vector.broadcast %cst_6 : f32 to vector<48x128xf32>
    %25 = arith.mulf %24, %23 : vector<48x128xf32>
    %cst_7 = arith.constant 2.000000e+00 : f32
    %26 = vector.broadcast %cst_7 : f32 to vector<48x128xf32>
    %27 = arith.subf %26, %25 : vector<48x128xf32>
    %cst_8 = arith.constant 0.000000e+00 : f32
    %28 = vector.broadcast %cst_8 : f32 to vector<48x128xf32>
    %29 = arith.maximumf %27, %28 : vector<48x128xf32>
    %30 = math.sqrt %29 : vector<48x128xf32>
    %cst_9 = arith.constant 0.000000e+00 : f32
    %31 = vector.broadcast %cst_9 : f32 to vector<48x128xf32>
    %32 = arith.cmpf ogt, %6, %31 : vector<48x128xf32>
    %cst_10 = arith.constant 0.000000e+00 : f32
    %33 = vector.broadcast %cst_10 : f32 to vector<48x128xf32>
    %34 = arith.cmpf oeq, %6, %33 : vector<48x128xf32>
    %35 = arith.andi %34, %20 : vector<48x128xi1>
    %36 = arith.extui %32 : vector<48x128xi1> to vector<48x128xi32>
    %37 = arith.sitofp %36 : vector<48x128xi32> to vector<48x128xf32>
    %38 = arith.extui %35 : vector<48x128xi1> to vector<48x128xi32>
    %39 = arith.sitofp %38 : vector<48x128xi32> to vector<48x128xf32>
    %cst_11 = arith.constant 0.000000e+00 : f32
    %40 = vector.broadcast %cst_11 : f32 to vector<48x128xf32>
    %41 = arith.maximumf %6, %40 : vector<48x128xf32>
    %cst_12 = arith.constant 1.000000e-01 : f32
    %42 = vector.broadcast %cst_12 : f32 to vector<48x128xf32>
    %43 = arith.subf %30, %42 : vector<48x128xf32>
    %cst_13 = arith.constant 0.000000e+00 : f32
    %44 = vector.broadcast %cst_13 : f32 to vector<48x128xf32>
    %45 = arith.maximumf %43, %44 : vector<48x128xf32>
    %46 = arith.mulf %45, %41 : vector<48x128xf32>
    %cst_14 = arith.constant 1.400000e+00 : f32
    %47 = vector.broadcast %cst_14 : f32 to vector<48x128xf32>
    %48 = arith.subf %47, %30 : vector<48x128xf32>
    %cst_15 = arith.constant 0.000000e+00 : f32
    %49 = vector.broadcast %cst_15 : f32 to vector<48x128xf32>
    %50 = arith.maximumf %48, %49 : vector<48x128xf32>
    %51 = arith.mulf %50, %39 : vector<48x128xf32>
    %cst_16 = arith.constant 1.000000e-01 : f32
    %52 = vector.broadcast %cst_16 : f32 to vector<48x128xf32>
    %53 = arith.subf %30, %52 : vector<48x128xf32>
    %54 = arith.mulf %53, %46 : vector<48x128xf32>
    %cst_17 = arith.constant 1.400000e+00 : f32
    %55 = vector.broadcast %cst_17 : f32 to vector<48x128xf32>
    %56 = arith.subf %55, %30 : vector<48x128xf32>
    %57 = arith.mulf %56, %51 : vector<48x128xf32>
    %58 = arith.addf %54, %57 : vector<48x128xf32>
    %cst_18 = arith.constant 2.400000e+01 : f32
    %59 = vector.broadcast %cst_18 : f32 to vector<48x128xf32>
    %60 = arith.mulf %59, %58 : vector<48x128xf32>
    %cst_19 = arith.constant 4.400000e+01 : f32
    %61 = vector.broadcast %cst_19 : f32 to vector<48x128xf32>
    %62 = arith.subf %60, %61 : vector<48x128xf32>
    %63 = math.exp %62 : vector<48x128xf32>
    %cst_20 = arith.constant 7.78113227E-20 : f32
    %64 = vector.broadcast %cst_20 : f32 to vector<48x128xf32>
    %65 = arith.mulf %64, %22 : vector<48x128xf32>
    %66 = arith.select %32, %63, %65 : vector<48x128xi1>, vector<48x128xf32>
    %67 = arith.select %35, %63, %65 : vector<48x128xi1>, vector<48x128xf32>
    %cst_21 = arith.constant dense<0.000000e+00> : vector<48xf32>
    %68 = vector.multi_reduction <add>, %66, %cst_21 [1] : vector<48x128xf32> to vector<48xf32>
    %69 = vector.shape_cast %68 : vector<48xf32> to vector<48x1xf32>
    %70 = math.log %69 : vector<48x1xf32>
    %cst_22 = arith.constant 8.800000e+01 : f32
    %71 = vector.broadcast %cst_22 : f32 to vector<48x1xf32>
    %72 = arith.addf %71, %70 : vector<48x1xf32>
    %cst_23 = arith.constant dense<0.000000e+00> : vector<48xf32>
    %73 = vector.multi_reduction <add>, %67, %cst_23 [1] : vector<48x128xf32> to vector<48xf32>
    %74 = vector.shape_cast %73 : vector<48xf32> to vector<48x1xf32>
    %75 = math.log %74 : vector<48x1xf32>
    %76 = arith.addf %72, %75 : vector<48x1xf32>
    %cst_24 = arith.constant 0.000000e+00 : f32
    %77 = vector.broadcast %cst_24 : f32 to vector<48x1xf32>
    %78 = arith.maximumf %76, %77 : vector<48x1xf32>
    %79 = math.absf %76 : vector<48x1xf32>
    %cst_25 = arith.constant 0.000000e+00 : f32
    %80 = vector.broadcast %cst_25 : f32 to vector<48x1xf32>
    %81 = arith.subf %80, %79 : vector<48x1xf32>
    %82 = math.exp %81 : vector<48x1xf32>
    %cst_26 = arith.constant 1.000000e+00 : f32
    %83 = vector.broadcast %cst_26 : f32 to vector<48x1xf32>
    %84 = arith.addf %83, %82 : vector<48x1xf32>
    %85 = math.log %84 : vector<48x1xf32>
    %86 = arith.addf %78, %85 : vector<48x1xf32>
    %cst_27 = arith.constant 0.0416666679 : f32
    %87 = vector.broadcast %cst_27 : f32 to vector<48x1xf32>
    %88 = arith.mulf %86, %87 : vector<48x1xf32>
    %cst_28 = arith.constant dense<0.000000e+00> : vector<48xf32>
    %89 = vector.multi_reduction <add>, %37, %cst_28 [1] : vector<48x128xf32> to vector<48xf32>
    %90 = vector.shape_cast %89 : vector<48xf32> to vector<48x1xf32>
    %cst_29 = arith.constant 0.000000e+00 : f32
    %91 = vector.broadcast %cst_29 : f32 to vector<48x1xf32>
    %92 = arith.cmpf ogt, %90, %91 : vector<48x1xf32>
    %cst_30 = arith.constant dense<0.000000e+00> : vector<48xf32>
    %93 = vector.multi_reduction <add>, %39, %cst_30 [1] : vector<48x128xf32> to vector<48xf32>
    %94 = vector.shape_cast %93 : vector<48xf32> to vector<48x1xf32>
    %cst_31 = arith.constant 0.000000e+00 : f32
    %95 = vector.broadcast %cst_31 : f32 to vector<48x1xf32>
    %96 = arith.cmpf ogt, %94, %95 : vector<48x1xf32>
    %97 = arith.andi %92, %96 : vector<48x1xi1>
    %98 = arith.extui %97 : vector<48x1xi1> to vector<48x1xi32>
    %99 = arith.sitofp %98 : vector<48x1xi32> to vector<48x1xf32>
    %100 = arith.mulf %88, %99 : vector<48x1xf32>
    %101 = vector.shape_cast %100 : vector<48x1xf32> to vector<1x48x1xf32>
    %cst_32 = arith.constant dense<0.000000e+00> : vector<1xf32>
    %102 = vector.multi_reduction <add>, %101, %cst_32 [1, 2] : vector<1x48x1xf32> to vector<1xf32>
    %103 = vector.shape_cast %102 : vector<1xf32> to vector<1x1x1xf32>
    %104 = vector.extract %103[0, 0, 0] : f32 from vector<1x1x1xf32>
    %105 = vector.shape_cast %99 : vector<48x1xf32> to vector<1x48x1xf32>
    %cst_33 = arith.constant dense<0.000000e+00> : vector<1xf32>
    %106 = vector.multi_reduction <add>, %105, %cst_33 [1, 2] : vector<1x48x1xf32> to vector<1xf32>
    %107 = vector.shape_cast %106 : vector<1xf32> to vector<1x1x1xf32>
    %108 = vector.extract %107[0, 0, 0] : f32 from vector<1x1x1xf32>
    %109 = tpu.iota {dimensions = array<i32: 0>} : vector<8x128xi32>
    %c0_i32_34 = arith.constant 0 : i32
    %110 = vector.broadcast %c0_i32_34 : i32 to vector<8x128xi32>
    %111 = arith.cmpi eq, %109, %110 : vector<8x128xi32>
    %cst_35 = arith.constant dense<0.000000e+00> : vector<128xf32>
    %112 = vector.multi_reduction <add>, %66, %cst_35 [0] : vector<48x128xf32> to vector<128xf32>
    %113 = vector.shape_cast %112 : vector<128xf32> to vector<1x128xf32>
    %c1_i32_36 = arith.constant 1 : i32
    %114 = vector.broadcast %c1_i32_36 : i32 to vector<8x128xi32>
    %115 = arith.cmpi eq, %109, %114 : vector<8x128xi32>
    %cst_37 = arith.constant dense<0.000000e+00> : vector<128xf32>
    %116 = vector.multi_reduction <add>, %67, %cst_37 [0] : vector<48x128xf32> to vector<128xf32>
    %117 = vector.shape_cast %116 : vector<128xf32> to vector<1x128xf32>
    %c2_i32 = arith.constant 2 : i32
    %118 = vector.broadcast %c2_i32 : i32 to vector<8x128xi32>
    %119 = arith.cmpi eq, %109, %118 : vector<8x128xi32>
    %cst_38 = arith.constant dense<0.000000e+00> : vector<128xf32>
    %120 = vector.multi_reduction <add>, %37, %cst_38 [0] : vector<48x128xf32> to vector<128xf32>
    %121 = vector.shape_cast %120 : vector<128xf32> to vector<1x128xf32>
    %c3_i32 = arith.constant 3 : i32
    %122 = vector.broadcast %c3_i32 : i32 to vector<8x128xi32>
    %123 = arith.cmpi eq, %109, %122 : vector<8x128xi32>
    %cst_39 = arith.constant dense<0.000000e+00> : vector<128xf32>
    %124 = vector.multi_reduction <add>, %39, %cst_39 [0] : vector<48x128xf32> to vector<128xf32>
    %125 = vector.shape_cast %124 : vector<128xf32> to vector<1x128xf32>
    %c4_i32 = arith.constant 4 : i32
    %126 = vector.broadcast %c4_i32 : i32 to vector<8x128xi32>
    %127 = arith.cmpi eq, %109, %126 : vector<8x128xi32>
    %c5_i32 = arith.constant 5 : i32
    %128 = vector.broadcast %c5_i32 : i32 to vector<8x128xi32>
    %129 = arith.cmpi eq, %109, %128 : vector<8x128xi32>
    %cst_40 = arith.constant 0.000000e+00 : f32
    %130 = vector.broadcast %108 : f32 to vector<8x128xf32>
    %131 = vector.broadcast %cst_40 : f32 to vector<8x128xf32>
    %132 = arith.select %129, %130, %131 : vector<8x128xi1>, vector<8x128xf32>
    %133 = vector.broadcast %104 : f32 to vector<8x128xf32>
    %134 = arith.select %127, %133, %132 : vector<8x128xi1>, vector<8x128xf32>
    %135 = vector.shape_cast %125 : vector<1x128xf32> to vector<1x128xf32>
    %136 = vector.broadcast %135 : vector<1x128xf32> to vector<8x128xf32>
    %137 = arith.select %123, %136, %134 : vector<8x128xi1>, vector<8x128xf32>
    %138 = vector.shape_cast %121 : vector<1x128xf32> to vector<1x128xf32>
    %139 = vector.broadcast %138 : vector<1x128xf32> to vector<8x128xf32>
    %140 = arith.select %119, %139, %137 : vector<8x128xi1>, vector<8x128xf32>
    %141 = vector.shape_cast %117 : vector<1x128xf32> to vector<1x128xf32>
    %142 = vector.broadcast %141 : vector<1x128xf32> to vector<8x128xf32>
    %143 = arith.select %115, %142, %140 : vector<8x128xi1>, vector<8x128xf32>
    %144 = vector.shape_cast %113 : vector<1x128xf32> to vector<1x128xf32>
    %145 = vector.broadcast %144 : vector<1x128xf32> to vector<8x128xf32>
    %146 = arith.select %111, %145, %143 : vector<8x128xi1>, vector<8x128xf32>
    %c0_41 = arith.constant 0 : index
    %c0_42 = arith.constant 0 : index
    %c0_43 = arith.constant 0 : index
    %147 = vector.load %arg5[%c0_41, %c0_42, %c0_43] : memref<1x8x128xf32, #tpu.memory_space<vmem>>, vector<1x8x128xf32>
    %148 = vector.shape_cast %146 : vector<8x128xf32> to vector<1x8x128xf32>
    %149 = arith.addf %147, %148 : vector<1x8x128xf32>
    %c0_44 = arith.constant 0 : index
    %c0_45 = arith.constant 0 : index
    %c0_46 = arith.constant 0 : index
    %150 = vector.load %arg5[%c0_44, %c0_45, %c0_46] : memref<1x8x128xf32, #tpu.memory_space<vmem>>, vector<1x8x128xf32>
    tpu.vector_store %arg5[%c0_44, %c0_45, %c0_46], %149 {strides = array<i32>} : memref<1x8x128xf32, #tpu.memory_space<vmem>>, vector<1x8x128xf32>,
    return
  }
  func.func @transform_0(%arg0: i32, %arg1: i32) -> (i32, i32) {
    %c1_i32 = arith.constant 1 : i32
    %0 = arith.muli %arg0, %c1_i32 : i32
    %1 = arith.addi %0, %arg1 : i32
    %c0_i32 = arith.constant 0 : i32
    %c0_i32_0 = arith.constant 0 : i32
    return %1, %c0_i32 : i32, i32
  }
  func.func @transform_1(%arg0: i32, %arg1: i32) -> (i32, i32) {
    %c0_i32 = arith.constant 0 : i32
    %c0_i32_0 = arith.constant 0 : i32
    %c0_i32_1 = arith.constant 0 : i32
    return %c0_i32, %c0_i32_0 : i32, i32
  }
  func.func @transform_2(%arg0: i32, %arg1: i32) -> (i32, i32) {
    %c1_i32 = arith.constant 1 : i32
    %0 = arith.muli %arg0, %c1_i32 : i32
    %1 = arith.addi %0, %arg1 : i32
    %c0_i32 = arith.constant 0 : i32
    %c0_i32_0 = arith.constant 0 : i32
    return %1, %c0_i32 : i32, i32
  }
  func.func @transform_3(%arg0: i32, %arg1: i32) -> (i32, i32, i32) {
    %c0_i32 = arith.constant 0 : i32
    %c0_i32_0 = arith.constant 0 : i32
    %c0_i32_1 = arith.constant 0 : i32
    return %arg0, %c0_i32, %c0_i32_0 : i32, i32, i32
  }
}

</mosaic_0001>

<bundles_post_ra>
// kernel: tpu_custom_call.1
= control target key start
LH: loop header
LB: loop body
LE: loop exit
PB: predicated region body
PF: predicated region fallthrough
CT: control target
= control target key end

     0   :  { %s2288_s0 = inlined_call_operand.hbm [shape: f32[96,128], index: 0, kind: input, shape index: {}]   ;;  %s2289_s1 = inlined_call_operand.hbm [shape: f32[128,128], index: 1, kind: input, shape index: {}]   ;;  %s2290_s2 = inlined_call_operand.hbm [shape: bf16[96,128], index: 2, kind: input, shape index: {}]   ;;  %s2291_s3 = inlined_call_operand.hbm [shape: f32[2,8,128], index: 3, kind: output, shape index: {}]  }
   0x1   :  { %2304 = sst [smem:[#allocation13_spill]] %s2288_s0 }
   0x2   :  { %8 = vsyncpa [#allocation3], 0 }
   0x3   :  { %10 = vsyncpa [#allocation3 + $0x1], 0 }
   0x4   :  { %11 = vsyncpa [#allocation6], 0 }
   0x5   :  { %12 = vsyncpa [#allocation4], 0 }
   0x6   :  { %14 = vsyncpa [#allocation4 + $0x1], 0  ;;  %s1613_s12 = smov 0   ;;  %s1615_s13 = smov 0  }
   0x7   :  { %s1617_s14 = smov 0   ;;  %s1619_s15 = smov 0  }
   0x8   :  { %s1621_s16 = smov 0   ;;  %s1623_s17 = smov 0  }
   0x9 LB: > { %s32_s18 = sadd.s32 1, %s1578_s16  ;;  %s41_s19 = sadd.s32 1, %s1570_s14  ;;  %s1582_s17 = sphi %s1623_s17, %s20_s17   ;;  %s1578_s16 = sphi %s1621_s16, %s2362_s16   ;;  %s1574_s15 = sphi %s1619_s15, %s2361_s15   ;;  %s1570_s14 = sphi %s1617_s14, %s2360_s14   ;;  %s1566_s13 = sphi %s1615_s13, %s2359_s13   ;;  %s1562_s12 = sphi %s1613_s12, %s2358_s12  }
   0xa   : > { %p34_p0 = scmp.ge.s32.totalorder %s32_s18, 2  ;;  %p48_p1 = scmp.ne.s32.totalorder %s1570_s14, %s1566_s13 }
   0xb   : > { %p49_p2 = scmp.eq.s32.totalorder %s1582_s17, 0  ;;  %p1275_p6 = scmp.lt.s32.totalorder %s1582_s17, 2 }
   0xc   : > { %s2364_s18 = smov (%p34_p0, %s32_s18), 0  ;;  %s166_s21 = sand.u32 1, %s1582_s17  }
   0xd   : > { %p50_p3 = por %p49_p2, %p48_p1  ;;  %s38_s20 = ssub.s32 %s1578_s16, %s2364_s18 }
   0xe   : > { %p39_p5 = scmp.eq.s32.totalorder %s38_s20, 0  ;;  %s168_s22 = sand.u32 1, %s1570_s14  }
   0xf   : > { %s1241_s24 = smul.u32 48, %s168_s22  ;;  %p1663_p7 = pnand %p1275_p6, %p50_p3 }
  0x10   : > { %s1660_s23 = scalar_select %p39_p5, %s1570_s14, %s41_s19  }
  0x11   : > { %s1114_s25 = smul.u32 768, %s1578_s16  ;;  %s2306_s0 = sld [smem:[#allocation13_spill]] }
  0x12   : > { %s2305_s26 = scalar_select %p1663_p7, 1, 0 }
  0x13   : > { %s1667_s27 = smul.u32 24, %s168_s22  ;;  %s170_s4 = scalar_lea.vmem [#allocation2], %s1241_s24 }
  0x14   : > { %s178_s5 = sshll.u32 %s170_s4, 4  ;;  %s1676_s6 = scalar_lea.sflag [#allocation3], %s166_s21  ;;  %s1674_s5 = int_to_ptr.vmem [resolvable:$true] %s178_s5 }
  0x15   : > { %p2295_p9 = pneg %p1663_p7 }
  0x17   : > { %s1672_s30 = scalar_lea.hbm %s2306_s0, %s1114_s25  ;;  %s1409_s10 = scalar_lea.hbm %s2306_s0, 1536 }
  0x18   : > { %s1404_s7 = scalar_lea.hbm %s1672_s30, 768  ;;  %p1410_p12 = scmp.lt.u32.totalorder %s1672_s30, %s2306_s0 }
  0x19   : > { %p1405_p8 = scmp.ne.s32.totalorder %s1672_s30, %s1404_s7  ;;  %p1411_p13 = scmp.lt.u32.totalorder %s1409_s10, %s1404_s7 }
  0x1a   : > { %p1413_p2 = scmp.lt.u32.totalorder %s1404_s7, %s1672_s30 }
  0x1b   : > { %p1407_p10 = pnand %p2295_p9, %p1405_p8  ;;  %p1412_p0 = por %p1411_p13, %p1410_p12 }
  0x1d   : > { %p1408_p11 = pneg %p1407_p10  ;;  %p1414_p3 = por %p1413_p2, %p1412_p0 }
  0x1f   : > { %p1415_p5 = pnand %p1414_p3, %p1408_p11 }
  0x21   : > { %1418 = shalt.err (!%p1415_p5)
}
  0x22   : > { %s1419_s20 = scalar_lea.vmem %s1674_s5, 768  ;;  %s1584_s21 = smov [#allocation2]  }
  0x23   : > { %p1420_p6 = scmp.ne.s32.totalorder %s1674_s5, %s1419_s20  ;;  %s1424_s22 = sshll.u32 %s1584_s21, 4  ;;  %s1425_s22 = int_to_ptr.vmem [resolvable:$false] %s1424_s22 }
  0x24   : > { %s1426_s24 = scalar_lea.vmem %s1425_s22, 1536  ;;  %p1427_p4 = scmp.lt.s32.totalorder %s1674_s5, %s1425_s22 }
  0x25   : > { %p1422_p8 = pnand %p1420_p6, %p2295_p9  ;;  %p1428_p12 = scmp.lt.s32.totalorder %s1426_s24, %s1419_s20 }
  0x27   : > { %p1423_p10 = pneg %p1422_p8  ;;  %p1429_p13 = por %p1428_p12, %p1427_p4 }
  0x29   : > { %p1430_p0 = pnand %p1429_p13, %p1423_p10 }
  0x2b   : > { %1433 = shalt.err (!%p1430_p0)
}
  0x2c   : > { %s2292_s25 = smov 128   ;;  %s2293_s28 = smov 8  }
  0x2d   : > { %1266 = dma.hbm_to_vmem [thread:$0]  (!%p1663_p7), %s1672_s30, 768, %s1674_s5, %s1676_s6, %s2292_s25, %s2292_s25, %s2293_s28  }
  0x2e   : > { %s1708_s29 = sadd.s32 4294967295, %s1582_s17   ;;  %s1065_s4 = sadd.s32 4294967294, %s1582_s17  }
  0x2f   : > { %p54_p4 = scmp.ne.s32.totalorder %s1566_s13, %s1562_s12  ;;  %p2294_p11 = scmp.eq.s32.totalorder %s1708_s29, 0 }
  0x30   : > { %p127_p2 = scmp.eq.s32.totalorder %s1708_s29, 1  ;;  %p133_p3 = scmp.eq.s32.totalorder %s1065_s4, 1 }
  0x31   : > { %p1066_p5 = scmp.ge.s32.totalorder %s1582_s17, 1  ;;  %p1718_p6 = por %p2294_p11, %p54_p4 }
  0x32   : > { %p1725_p8 = por %p127_p2, %p48_p1  ;;  %p1729_p10 = por %p133_p3, %p54_p4 }
  0x33   : > { %s2307_s7 = scalar_select %p1718_p6, 1, 0 }
  0x34   : > { %s2308_s30 = scalar_select %p1725_p8, 1, 0 }
  0x35   : > { %s2309_s5 = scalar_select %p1729_p10, 1, 0 }
  0x36   : > { %p140_p12 = scmp.lt.s32.totalorder %s1582_s17, 3  ;;  %s1587_s9 = smov [#allocation5]  }
  0x37   : > { %s152_s10 = sshll.u32 %s1587_s9, 4  ;;  %s1115_s11 = smul.u32 384, %s1578_s16  ;;  %s153_s10 = int_to_ptr.vmem [resolvable:$true] %s152_s10 }
  0x38   : > { %p1734_p13 = pnand %p1066_p5, %p140_p12  ;;  %s192_s19 = scalar_lea.vmem [#allocation7], %s1667_s27 }
  0x39   : > { %s200_s20 = sshll.u32 %s192_s19, 4  ;;  %s1745_s24 = scalar_lea.hbm %s2290_s2, %s1115_s11  ;;  %s1753_s20 = int_to_ptr.vmem [resolvable:$true] %s200_s20 }
  0x3a   : > { %s2310_s8 = scalar_select %p1734_p13, 1, 0 }
  0x3b   : > { %p1259_p0 = pneg %p1734_p13  ;;  %s1434_s28 = scalar_lea.hbm %s2289_s1, 2048 }
  0x3c   : > { %p1435_p4 = scmp.ne.s32.totalorder %s2289_s1, %s1434_s28  ;;  %p1441_p12 = scmp.lt.u32.totalorder %s1434_s28, %s2289_s1 }
  0x3d   : > { %p1749_p1 = pnand %p1259_p0, %p2294_p11 }
  0x3f   : > { %p1436_p2 = pneg %p1749_p1 }
  0x41   : > { %p1437_p3 = pnand %p1436_p2, %p1435_p4 }
  0x43   : > { %p1438_p5 = pneg %p1437_p3 }
  0x45   : > { %p1443_p0 = pnand %p1441_p12, %p1438_p5 }
  0x47   : > { %1446 = shalt.err (!%p1443_p0)
}
  0x48   : > { %s1447_s22 = scalar_lea.vmem %s153_s10, 2048  ;;  %p1455_p8 = scmp.lt.s32.totalorder %s153_s10, %s153_s10 }
  0x49   : > { %p1448_p11 = scmp.ne.s32.totalorder %s153_s10, %s1447_s22  ;;  %p1456_p6 = scmp.lt.s32.totalorder %s1447_s22, %s1447_s22 }
  0x4b   : > { %p1450_p9 = pnand %p1448_p11, %p1436_p2  ;;  %p1457_p13 = por %p1456_p6, %p1455_p8 }
  0x4d   : > { %p1451_p10 = pneg %p1450_p9 }
  0x4f   : > { %p1458_p7 = pnand %p1457_p13, %p1451_p10 }
  0x51   : > { %1461 = shalt.err (!%p1458_p7)
}
  0x52   : > { %s2312_s25 = smov 8   ;;  %s2313_s9 = smov 128  }
  0x53   : > { %1262 = dma.hbm_to_vmem [thread:$0]  (!%p1749_p1), %s2289_s1, 2048, %s153_s10, [#allocation6], %s2313_s9, %s2313_s9, %s2312_s25  }
  0x54   : > { %s1462_s28 = scalar_lea.hbm %s1745_s24, 384  ;;  %p2314_p11 = scmp.ne.s32.totalorder %s2305_s26, 0 }
  0x55   : > { %p1463_p9 = scmp.ne.s32.totalorder %s1745_s24, %s1462_s28  ;;  %s1467_s21 = scalar_lea.hbm %s2290_s2, 768 }
  0x56   : > { %p2315_p6 = pneg %p2314_p11  ;;  %p1468_p10 = scmp.lt.u32.totalorder %s1745_s24, %s2290_s2 }
  0x57   : > { %p1469_p13 = scmp.lt.u32.totalorder %s1467_s21, %s1462_s28  ;;  %p1471_p2 = scmp.lt.u32.totalorder %s1462_s28, %s1745_s24 }
  0x58   : > { %p1465_p8 = pnand %p1463_p9, %p2315_p6 }
  0x59   : > { %p1470_p4 = por %p1469_p13, %p1468_p10 }
  0x5a   : > { %p1466_p7 = pneg %p1465_p8 }
  0x5b   : > { %p1472_p3 = por %p1471_p2, %p1470_p4 }
  0x5d   : > { %p1473_p5 = pnand %p1472_p3, %p1466_p7 }
  0x5f   : > { %1476 = shalt.err (!%p1473_p5)
}
  0x60   : > { %s1477_s10 = scalar_lea.vmem %s1753_s20, 384  ;;  %p2316_p12 = pmov %p2315_p6 }
  0x61   : > { %p1478_p1 = scmp.ne.s32.totalorder %s1753_s20, %s1477_s10  ;;  %s1588_s25 = smov [#allocation7]  }
  0x62   : > { %s1482_s9 = sshll.u32 %s1588_s25, 4  ;;  %s1483_s9 = int_to_ptr.vmem [resolvable:$false] %s1482_s9 }
  0x63   : > { %p1480_p0 = pnand %p1478_p1, %p2316_p12  ;;  %s1484_s0 = scalar_lea.vmem %s1483_s9, 768 }
  0x64   : > { %p1485_p6 = scmp.lt.s32.totalorder %s1753_s20, %s1483_s9  ;;  %p1486_p8 = scmp.lt.s32.totalorder %s1484_s0, %s1477_s10 }
  0x65   : > { %p1481_p9 = pneg %p1480_p0 }
  0x66   : > { %p1487_p10 = por %p1486_p8, %p1485_p6 }
  0x68   : > { %p1488_p13 = pnand %p1487_p10, %p1481_p9 }
  0x6a   : > { %1491 = shalt.err (!%p1488_p13)
}
  0x6b   : > { %s1589_s27 = smov 64   ;;  %s1590_s19 = smov 4  }
  0x6c   : > { %1269 = dma.hbm_to_vmem [thread:$0]  (!%p2314_p11), %s1745_s24, 384, %s1753_s20, %s1676_s6, %s1589_s27, %s1589_s27, %s1590_s19  }
  0x6d   : > { %p2317_p7 = scmp.ne.s32.totalorder %s2310_s8, 0 }
  0x6e   : > { %s214_s28 = sand.u32 (!%p2317_p7), 1, %s1708_s29   ;;  %s1802_s11 = sand.u32 (!%p2317_p7), 1, %s1566_s13  }
  0x6f   : > { %212 = sbr.rel (%p2317_p7) target bundleno = 900 (0x384), region = 32  ;;  %s215_s21 = scalar_lea.sflag (!%p2317_p7), [#allocation3], %s214_s28 }
  0x70   : > { %s1243_s4 = smul.u32 (!%p2317_p7), 48, %s1802_s11  ;;  %p2318_p4 = scmp.ne.s32.totalorder (!%p2317_p7), %s2307_s7, 0 }
  0x72   : > { %s1805_s22 = scalar_lea.vmem (!%p2317_p7), [#allocation2], %s1243_s4 }
  0x76   : > { %1545 = dma.done.wait (%p2318_p4), %s215_s21, 768  }
  0x77   : > { %1547 = vsyncadd (%p2318_p4), %s215_s21, 4294966528  ;;  %p2319_p11 = scmp.eq.s32.totalorder %s1708_s29, 0 }
  0x79   : > { %1549 = dma.done.wait (%p2319_p11), [#allocation6], 2048   ;;  %p2320_p2 = pmov %p2319_p11 }
  0x7a   : > { %s1244_s26 = smul.u32 24, %s1802_s11 }
  0x7b   : > { %1551 = vsyncadd (%p2320_p2), [#allocation6], 4294965248 }
  0x7c   : > { %s1816_s6 = scalar_lea.vmem [#allocation7], %s1244_s26 }
  0x7d   : > { %1553 = dma.done.wait (%p2318_p4), %s215_s21, 384  }
  0x7e   : > { %1555 = vsyncadd (%p2318_p4), %s215_s21, 4294966912  ;;  %v274_v0 = vld [vmem:[#allocation5] sm:$0xff]  ;;  %v275_v1 = vld [vmem:[#allocation5 + $0x8] sm:$0xff]  ;;  %v304_v30 = vlaneseq  ;;  %s303_s29 = smul.u32 48, %s1574_s15  ;;  %s1073_s8 = sshll.u32 %s1802_s11, 3 }
  0x7f   : > { %v276_v2 = vld [vmem:[#allocation5 + $0x10] sm:$0xff]  ;;  %v1193_v3 = vpack.c.bf16 %v275_v1, %v274_v0  ;;  %v277_v4 = vld [vmem:[#allocation5 + $0x18] sm:$0xff]  ;;  %v278_v8 = vld [vmem:[#allocation5 + $0x20] sm:$0xff]  ;;  %s1111_s24 = sshll.u32 %s1574_s15, 7  ;;  %s258_s10 = scalar_lea.vmem [#allocation8], %s1073_s8 }
  0x80   : > { %v1197_v5 = vpack.c.bf16 %v277_v4, %v276_v2  ;;  %v268_v6 = vld [vmem:[%s1805_s22] sm:$0xff]  ;;  %v270_v7 = vld [vmem:[%s1805_s22 + $0x10] sm:$0xff]  ;;  %v279_v9 = vld [vmem:[#allocation5 + $0x28] sm:$0xff]  ;;  %v1828_v31 = vshrl.u32 %v304_v30, 7  ;;  %v311_v33 = vstv %s303_s29  ;;  %v319_v38 = vand.u32 127, %v304_v30  ;;  %s954_s25 = sshll.u32 %s258_s10, 4  ;;  %s2239_s27 = scalar_lea.hbm %s2291_s3, %s1111_s24  ;;  %s2241_s25 = int_to_ptr.vmem [resolvable:$true] %s954_s25 }
  0x81   : > { %1194 = vmatprep.subr.bf16.mxu0 %v1193_v3  ;;  %1225 = vmatprep.subr.bf16.mxu1 %v1193_v3  ;;  %v1201_v10 = vpack.c.bf16 %v279_v9, %v278_v8  ;;  %v280_v11 = vld [vmem:[#allocation5 + $0x30] sm:$0xff]  ;;  %v281_v12 = vld [vmem:[#allocation5 + $0x38] sm:$0xff]  ;;  %v282_v14 = vld [vmem:[#allocation5 + $0x40] sm:$0xff]  ;;  %v2327_v9 = vmov 0  ;;  %s941_s19 = scalar_lea.sflag [#allocation4], %s1802_s11  ;;  %s1492_s28 = scalar_lea.vmem %s2241_s25, 128 }
  0x82   : > { %1196 = vmatpush3.bf16.xpose.msra.mxu0 %v1193_v3  ;;  %1233 = vmatpush3.bf16.xpose.msra.mxu1 %v1193_v3  ;;  %v1205_v13 = vpack.c.bf16 %v281_v12, %v280_v11  ;;  %v283_v15 = vld [vmem:[#allocation5 + $0x48] sm:$0xff]  ;;  %v284_v17 = vld [vmem:[#allocation5 + $0x50] sm:$0xff]  ;;  %v285_v18 = vld [vmem:[#allocation5 + $0x58] sm:$0xff]  ;;  %v308_v32 = vadd.s32 24, %v1828_v31  ;;  %v306_v34 = vadd.s32 8, %v1828_v31  ;;  %v307_v36 = vadd.s32 16, %v1828_v31  ;;  %p1493_p3 = scmp.ne.s32.totalorder %s2241_s25, %s1492_s28 }
  0x83   : > { %1198 = vmatprep.subr.bf16.mxu0 %v1197_v5  ;;  %1226 = vmatprep.subr.bf16.mxu1 %v1197_v5  ;;  %v1209_v16 = vpack.c.bf16 %v283_v15, %v282_v14  ;;  %v1213_v19 = vpack.c.bf16 %v285_v18, %v284_v17  ;;  %v286_v20 = vld [vmem:[#allocation5 + $0x60] sm:$0xff]  ;;  %v287_v21 = vld [vmem:[#allocation5 + $0x68] sm:$0xff]  ;;  %v288_v23 = vld [vmem:[#allocation5 + $0x70] sm:$0xff]  ;;  %v310_v43 = vadd.s32 40, %v1828_v31  ;;  %vm326_vm1 = vcmp.lt.s32.totalorder %v319_v38, 28  ;;  %p2355_p5 = scmp.ne.s32.totalorder %s2308_s30, 0 }
  0x84   : > { %1184 = vmatprep.mubr.f32.mxu0 %v268_v6  ;;  %1187 = vmatprep.mubr.f32.mxu1 %v270_v7  ;;  %v1217_v22 = vpack.c.bf16 %v287_v21, %v286_v20  ;;  %v289_v24 = vld [vmem:[#allocation5 + $0x78] sm:$0xff]  ;;  %v272_v28 = vld [vmem:[%s1805_s22 + $0x20] sm:$0xff]  ;;  %v1128_v35 = vld [vmem:[%s1816_s6 + $0x8] sm:$0xff]   ;;  %v315_v37 = vadd.s32 %v311_v33, %v308_v32  ;;  %v313_v41 = vadd.s32 %v311_v33, %v306_v34  ;;  %v309_v46 = vadd.s32 32, %v1828_v31  ;;  %s1592_s15 = smov [#allocation8]  }
  0x85   : > { %v1221_v25 = vpack.c.bf16 %v289_v24, %v288_v23  ;;  %v269_v26 = vld [vmem:[%s1805_s22 + $0x8] sm:$0xff]  ;;  %v271_v27 = vld [vmem:[%s1805_s22 + $0x18] sm:$0xff]  ;;  %v1836_v40 = vunpack.c.h.bf16 %v1128_v35  ;;  %v314_v42 = vadd.s32 %v311_v33, %v307_v36  ;;  %v1841_v45 = vunpack.c.l.bf16 %v1128_v35  ;;  %p1494_p1 = pnand %p1493_p3, %p2355_p5  ;;  %s1496_s4 = sshll.u32 %s1592_s15, 4  ;;  %s1497_s4 = int_to_ptr.vmem [resolvable:$false] %s1496_s4 }
  0x86   : > { %v273_v29 = vld [vmem:[%s1805_s22 + $0x28] sm:$0xff]  ;;  %vm323_vm0 = vcmp.lt.s32.totalorder %v315_v37, 45  ;;  %vm321_vm3 = vcmp.lt.s32.totalorder %v313_v41, 45  ;;  %v312_v49 = vadd.s32 %v311_v33, %v1828_v31  ;;  %v1129_v54 = vld [vmem:[%s1816_s6 + $0x10] sm:$0xff]   ;;  %v317_v55 = vadd.s32 %v311_v33, %v310_v43  ;;  %s1498_s21 = scalar_lea.vmem %s1497_s4, 256  ;;  %p1499_p0 = scmp.lt.s32.totalorder %s2241_s25, %s1497_s4 }
  0x87   : > { %v1117_v39 = vld [vmem:[%s1816_s6] sm:$0xff]   ;;  %vm523_vm2 = vcmp.eq.f32.partialorder %v1836_v40, 0.0  ;;  %vm322_vm4 = vcmp.lt.s32.totalorder %v314_v42, 45  ;;  %vm1849_vm5 = vmand %vm323_vm0, %vm326_vm1  ;;  %vm522_vm8 = vcmp.eq.f32.partialorder %v1841_v45, 0.0  ;;  %v316_v63 = vadd.s32 %v311_v33, %v309_v46  ;;  %p1495_p12 = pneg %p1494_p1  ;;  %p1500_p9 = scmp.lt.s32.totalorder %s1498_s21, %s1492_s28 }
  0x88   : > { %v1839_v44 = vunpack.c.h.bf16 %v1117_v39  ;;  %v1854_v59 = vunpack.c.l.bf16 %v1117_v39  ;;  %vm1858_vm7 = vmand %vm321_vm3, %vm326_vm1  ;;  %vm320_vm10 = vcmp.lt.s32.totalorder %v312_v49, 45  ;;  %v1869_v4 = vunpack.c.h.bf16 %v1129_v54 }
  0x89   : > { %vm1865_vm9 = vmand %vm322_vm4, %vm326_vm1  ;;  %vm325_vm12 = vcmp.lt.s32.totalorder %v317_v55, 45  ;;  %v1895_v14 = vunpack.c.l.bf16 %v1129_v54  ;;  %vm324_vm15 = vcmp.lt.s32.totalorder %v316_v63, 45  ;;  %v2341_v24 = vmov 0  ;;  %p1501_p6 = por %p1500_p9, %p1499_p0 }
  0x8a   : > { %1200 = vmatpush3.bf16.xpose.msra.mxu0 %v1197_v5  ;;  %1234 = vmatpush3.bf16.xpose.msra.mxu1 %v1197_v5  ;;  %vm521_vm6 = vcmp.eq.f32.partialorder %v1839_v44, 0.0  ;;  %vm1879_vm11 = vmand %vm523_vm2, %vm1849_vm5  ;;  %vm520_vm2 = vcmp.eq.f32.partialorder %v1854_v59, 0.0  ;;  %vm525_vm4 = vcmp.eq.f32.partialorder %v1869_v4, 0.0  ;;  %v557_v30 = vmax.f32 %v1839_v44, 0.0 }
  0x8b   : > { %1202 = vmatprep.subr.bf16.mxu0 %v1201_v10  ;;  %1227 = vmatprep.subr.bf16.mxu1 %v1201_v10  ;;  %v2328_v9 = vsel %vm1879_vm11, 4294967295, %v2327_v9  ;;  %vm1891_vm13 = vmand %vm521_vm6, %vm1858_vm7  ;;  %v558_v32 = vmax.f32 %v1841_v45, 0.0  ;;  %v556_v35 = vmax.f32 %v1854_v59, 0.0  ;;  %v561_v36 = vmax.f32 %v1869_v4, 0.0  ;;  %p1502_p8 = pnand %p1501_p6, %p1495_p12 }
  0x8c   : > { %vm1902_vm14 = vmand %vm522_vm8, %vm1865_vm9  ;;  %vm524_vm8 = vcmp.eq.f32.partialorder %v1895_v14, 0.0  ;;  %v560_v39 = vmax.f32 %v1895_v14, 0.0 }
  0x8d   : > { %vm1909_vm0 = vmand %vm320_vm10, %vm326_vm1 }
  0x8e   : > { %vm1917_vm3 = vmand %vm325_vm12, %vm326_vm1 }
  0x8f   : > { %vm1924_vm6 = vmand %vm324_vm15, %vm326_vm1 }
  0x90   : > { %vm1935_vm10 = vmand %vm520_vm2, %vm1909_vm0 }
  0x91   : > { %vm1941_vm12 = vmand %vm525_vm4, %vm1917_vm3 }
  0x92   : > { %1204 = vmatpush3.bf16.xpose.msra.mxu0 %v1201_v10  ;;  %1235 = vmatpush3.bf16.xpose.msra.mxu1 %v1201_v10  ;;  %v2342_v24 = vsel %vm1941_vm12, 4294967295, %v2341_v24  ;;  %vm1954_vm1 = vmand %vm524_vm8, %vm1924_vm6 }
  0x93   : > { %1206 = vmatprep.subr.bf16.mxu0 %v1205_v13  ;;  %1228 = vmatprep.subr.bf16.mxu1 %v1205_v13 }
  0x9a   : > { %1208 = vmatpush3.bf16.xpose.msra.mxu0 %v1205_v13  ;;  %1236 = vmatpush3.bf16.xpose.msra.mxu1 %v1205_v13 }
  0x9b   : > { %1210 = vmatprep.subr.bf16.mxu0 %v1209_v16  ;;  %1229 = vmatprep.subr.bf16.mxu1 %v1209_v16 }
  0xa2   : > { %1212 = vmatpush3.bf16.xpose.msra.mxu0 %v1209_v16  ;;  %1237 = vmatpush3.bf16.xpose.msra.mxu1 %v1209_v16 }
  0xa3   : > { %1214 = vmatprep.subr.bf16.mxu0 %v1213_v19  ;;  %1230 = vmatprep.subr.bf16.mxu1 %v1213_v19 }
  0xaa   : > { %1216 = vmatpush3.bf16.xpose.msra.mxu0 %v1213_v19  ;;  %1238 = vmatpush3.bf16.xpose.msra.mxu1 %v1213_v19 }
  0xab   : > { %1218 = vmatprep.subr.bf16.mxu0 %v1217_v22  ;;  %1231 = vmatprep.subr.bf16.mxu1 %v1217_v22 }
  0xb2   : > { %1220 = vmatpush3.bf16.xpose.msra.mxu0 %v1217_v22  ;;  %1239 = vmatpush3.bf16.xpose.msra.mxu1 %v1217_v22 }
  0xb3   : > { %1222 = vmatprep.subr.bf16.mxu0 %v1221_v25  ;;  %1232 = vmatprep.subr.bf16.mxu1 %v1221_v25 }
  0xba   : > { %1224 = vmatpush3.bf16.xpose.msra.mxu0 %v1221_v25  ;;  %1240 = vmatpush3.bf16.xpose.msra.mxu1 %v1221_v25  ;;  %v1591_v25 = vmov 0.0  }
  0xbb   : > { %v1969_v33 = vsel %vm1902_vm14, 1.0, %v1591_v25  ;;  %v1974_v34 = vsel %vm1935_vm10, 1.0, %v1591_v25  ;;  %v1982_v37 = vsel %vm1941_vm12, 1.0, %v1591_v25  ;;  %v1987_v38 = vsel %vm1954_vm1, 1.0, %v1591_v25 }
  0xbc   : > { %v1076_v62 = vsel %vm1865_vm9, 1.0, %v1591_v25  ;;  %v1074_v58 = vsel %vm1909_vm0, 1.0, %v1591_v25  ;;  %vm2352_vm9 = vnez %v2328_v9  ;;  %vm518_vm0 = vcmp.gt.f32.partialorder %v1895_v14, 0.0 }
  0xc1   : > { %1185 = vmatmul.mubr.f32.vlgmr.msra.gmra.mrb[0].mxu0 %v269_v26  ;;  %1188 = vmatmul.mubr.f32.vlgmr.msra.gmra.mrb[0].mxu1 %v271_v27  ;;  %v1949_v26 = vsel %vm1879_vm11, 1.0, %v1591_v25  ;;  %v559_v27 = vmax.f32 %v1836_v40, 0.0 }
  0xc2   : > { %1190 = vmatprep.mubr.f32.mxu1 %v272_v28  ;;  %v2343_v28 = vmov 0 }
  0xc3   : > { %v2344_v28 = vsel %vm1954_vm1, 4294967295, %v2343_v28 }
  0xc5   : > { %1191 = vmatmul.mubr.f32.gmra.mrb[2].mxu1 %v273_v29  ;;  %v1962_v29 = vsel %vm1891_vm13, 1.0, %v1591_v25 }
 0x194   : > { %v1186_v47 = vpop.f32.mrb[0].mxu0  ;;  %v1189_v48 = vpop.f32.mrb[0].mxu1 }
 0x195   : > { %v455_v50 = vmul.f32 2.0, %v1186_v47  ;;  %v457_v51 = vmul.f32 2.0, %v1189_v48  ;;  %v425_v52 = vpop.f32.mrb[1].mxu0  ;;  %v435_v53 = vpop.f32.mrb[1].mxu1 }
 0x196   : > { %v454_v56 = vmul.f32 2.0, %v425_v52  ;;  %v456_v57 = vmul.f32 2.0, %v435_v53 }
 0x197   : > { %v461_v60 = vsub.f32 2.0, %v455_v50  ;;  %v463_v61 = vsub.f32 2.0, %v457_v51 }
 0x198   : > { %v460_v0 = vsub.f32 2.0, %v454_v56  ;;  %v462_v1 = vsub.f32 2.0, %v456_v57  ;;  %v1192_v2 = vpop.f32.mrb[2].mxu1 }
 0x199   : > { %v1871_v5 = vmax.f32 %v461_v60, 0.0  ;;  %v1873_v6 = vmax.f32 %v463_v61, 0.0  ;;  %v459_v7 = vmul.f32 2.0, %v1192_v2  ;;  %v445_v8 = vpop.f32.mrb[3].mxu1 }
 0x19a   : > { %v1883_v10 = vmax.f32 %v460_v0, 0.0  ;;  %v1885_v11 = vmax.f32 %v462_v1, 0.0  ;;  %v458_v12 = vmul.f32 2.0, %v445_v8 }
 0x19b   : > { %1332 = vrsqrt.f32 %v1871_v5  ;;  %v465_v17 = vsub.f32 2.0, %v459_v7  ;;  %v484_v42 = vand.u32 2147483648, %v1871_v5  ;;  %v498_v43 = vand.u32 2147483648, %v1873_v6 }
 0x19c   : > { %1334 = vrsqrt.f32 %v1873_v6  ;;  %v464_v18 = vsub.f32 2.0, %v458_v12  ;;  %v491_v48 = vand.u32 2147483648, %v1885_v11  ;;  %vm483_vm15 = vcmp.eq.f32.partialorder %v1871_v5, 0.0 }
 0x19d   : > { %1336 = vrsqrt.f32 %v1883_v10  ;;  %v1929_v21 = vmax.f32 %v465_v17, 0.0  ;;  %vm474_vm2 = vcmp.eq.f32.partialorder %v1883_v10, inf  ;;  %vm2345_vm4 = vcmp.eq.f32.partialorder %v1871_v5, inf }
 0x19e   : > { %1338 = vrsqrt.f32 %v1885_v11  ;;  %v1931_v22 = vmax.f32 %v464_v18, 0.0  ;;  %v477_v55 = vand.u32 2147483648, %v1883_v10  ;;  %vm2346_vm12 = vcmp.eq.f32.partialorder %v1873_v6, inf }
 0x19f   : > { %1340 = vrsqrt.f32 %v1929_v21  ;;  %v512_v52 = vand.u32 2147483648, %v1929_v21  ;;  %vm2347_vm1 = vcmp.eq.f32.partialorder %v1873_v6, 0.0  ;;  %vm2348_vm8 = vcmp.eq.f32.partialorder %v1885_v11, inf }
 0x1a0   : > { %1342 = vrsqrt.f32 %v1931_v22  ;;  %v505_v57 = vand.u32 2147483648, %v1931_v22  ;;  %vm2349_vm11 = vcmp.eq.f32.partialorder %v1883_v10, 0.0 }
 0x1a5   : > { %v1333_v41 = vpop.eup %1332 }
 0x1a6   : > { %v1335_v46 = vpop.eup %1334  ;;  %v480_v47 = vmul.f32 %v1333_v41, %v1871_v5 }
 0x1a7   : > { %v1337_v49 = vpop.eup %1336  ;;  %v494_v50 = vmul.f32 %v1335_v46, %v1873_v6 }
 0x1a8   : > { %v1339_v51 = vpop.eup %1338  ;;  %v482_v53 = vsel %vm2345_vm4, %v1871_v5, %v480_v47  ;;  %v473_v54 = vmul.f32 %v1337_v49, %v1883_v10  ;;  %vm511_vm4 = vcmp.eq.f32.partialorder %v1929_v21, 0.0 }
 0x1a9   : > { %v487_v56 = vmul.f32 %v1339_v51, %v1885_v11  ;;  %v496_v60 = vsel %vm2346_vm12, %v1873_v6, %v494_v50  ;;  %v485_v61 = vsel %vm483_vm15, %v484_v42, %v482_v53  ;;  %v1341_v5 = vpop.eup %1340  ;;  %vm502_vm12 = vcmp.eq.f32.partialorder %v1931_v22, inf }
 0x1aa   : > { %v499_v63 = vsel %vm2347_vm1, %v498_v43, %v496_v60  ;;  %v1093_v0 = vadd.f32 -0.1, %v485_v61  ;;  %v581_v1 = vsub.f32 1.4, %v485_v61  ;;  %v475_v2 = vsel %vm474_vm2, %v1883_v10, %v473_v54  ;;  %v1343_v18 = vpop.eup %1342 }
 0x1ab   : > { %v1095_v7 = vadd.f32 -0.1, %v499_v63  ;;  %v583_v8 = vsub.f32 1.4, %v499_v63  ;;  %v489_v12 = vsel %vm2348_vm8, %v1885_v11, %v487_v56  ;;  %v478_v17 = vsel %vm2349_vm11, %v477_v55, %v475_v2 }
 0x1ac   : > { %v508_v6 = vmul.f32 %v1341_v5, %v1929_v21  ;;  %v569_v41 = vmax.f32 %v1093_v0, 0.0  ;;  %v587_v42 = vmax.f32 %v581_v1, 0.0  ;;  %vm2350_vm1 = vcmp.eq.f32.partialorder %v1885_v11, 0.0 }
 0x1ad   : > { %v492_v43 = vsel %vm2350_vm1, %v491_v48, %v489_v12  ;;  %v501_v46 = vmul.f32 %v1343_v18, %v1931_v22  ;;  %v571_v47 = vmax.f32 %v1095_v7, 0.0  ;;  %v589_v49 = vmax.f32 %v583_v8, 0.0 }
 0x1ae   : > { %v1094_v50 = vadd.f32 -0.1, %v492_v43  ;;  %vm504_vm15 = vcmp.eq.f32.partialorder %v1931_v22, 0.0  ;;  %v575_v51 = vmul.f32 %v569_v41, %v557_v30  ;;  %v593_v10 = vmul.f32 %v1962_v29, %v587_v42 }
 0x1af   : > { %v582_v53 = vsub.f32 1.4, %v492_v43  ;;  %v1092_v54 = vadd.f32 -0.1, %v478_v17  ;;  %v577_v55 = vmul.f32 %v571_v47, %v559_v27  ;;  %v595_v56 = vmul.f32 %v1949_v26, %v589_v49 }
 0x1b0   : > { %v570_v60 = vmax.f32 %v1094_v50, 0.0  ;;  %v580_v11 = vsub.f32 1.4, %v478_v17  ;;  %v599_v48 = vmul.f32 %v1093_v0, %v575_v51  ;;  %v605_v61 = vmul.f32 %v593_v10, %v581_v1 }
 0x1b1   : > { %v588_v63 = vmax.f32 %v582_v53, 0.0  ;;  %v568_v2 = vmax.f32 %v1092_v54, 0.0  ;;  %v601_v5 = vmul.f32 %v1095_v7, %v577_v55  ;;  %v607_v12 = vmul.f32 %v595_v56, %v583_v8 }
 0x1b2   : > { %v576_v30 = vmul.f32 %v570_v60, %v558_v32  ;;  %v586_v18 = vmax.f32 %v580_v11, 0.0  ;;  %v611_v41 = vadd.f32 %v605_v61, %v599_v48  ;;  %vm2351_vm11 = vcmp.eq.f32.partialorder %v1929_v21, inf }
 0x1b3   : > { %v594_v42 = vmul.f32 %v1969_v33, %v588_v63  ;;  %v574_v27 = vmul.f32 %v568_v2, %v556_v35  ;;  %v510_v17 = vsel %vm2351_vm11, %v1929_v21, %v508_v6  ;;  %v613_v0 = vadd.f32 %v607_v12, %v601_v5 }
 0x1b4   : > { %v600_v1 = vmul.f32 %v1094_v50, %v576_v30  ;;  %v592_v43 = vmul.f32 %v1974_v34, %v586_v18  ;;  %v513_v7 = vsel %vm511_vm4, %v512_v52, %v510_v17  ;;  %v617_v8 = vmul.f32 24.0, %v611_v41 }
 0x1b5   : > { %v606_v32 = vmul.f32 %v594_v42, %v582_v53  ;;  %v598_v47 = vmul.f32 %v1092_v54, %v574_v27  ;;  %v1097_v49 = vadd.f32 -0.1, %v513_v7  ;;  %v619_v51 = vmul.f32 24.0, %v613_v0 }
 0x1b6   : > { %v604_v10 = vmul.f32 %v592_v43, %v580_v11  ;;  %v585_v55 = vsub.f32 1.4, %v513_v7  ;;  %v503_v35 = vsel %vm502_vm12, %v1931_v22, %v501_v46  ;;  %v1099_v56 = vadd.f32 -44.0, %v617_v8 }
 0x1b7   : > { %v612_v6 = vadd.f32 %v606_v32, %v600_v1  ;;  %v573_v60 = vmax.f32 %v1097_v49, 0.0  ;;  %v506_v50 = vsel %vm504_vm15, %v505_v57, %v503_v35  ;;  %v1101_v48 = vadd.f32 -44.0, %v619_v51 }
 0x1b8   : > { %v610_v21 = vadd.f32 %v604_v10, %v598_v47  ;;  %v591_v52 = vmax.f32 %v585_v55, 0.0  ;;  %v1096_v61 = vadd.f32 -0.1, %v506_v50  ;;  %v630_v53 = vmul.f32 1.442695, %v1099_v56 }
 0x1b9   : > { %v618_v54 = vmul.f32 24.0, %v612_v6  ;;  %v579_v11 = vmul.f32 %v573_v60, %v561_v36  ;;  %v584_v63 = vsub.f32 1.4, %v506_v50  ;;  %v634_v2 = vmul.f32 1.442695, %v1101_v48 }
 0x1ba   : > { %v616_v5 = vmul.f32 24.0, %v610_v21  ;;  %v597_v46 = vmul.f32 %v1982_v37, %v591_v52  ;;  %v572_v12 = vmax.f32 %v1096_v61, 0.0  ;;  %1344 = vpow2.f32 %v630_v53 }
 0x1bb   : > { %v1100_v30 = vadd.f32 -44.0, %v618_v54  ;;  %v603_v18 = vmul.f32 %v1097_v49, %v579_v11  ;;  %v590_v22 = vmax.f32 %v584_v63, 0.0  ;;  %1346 = vpow2.f32 %v634_v2 }
 0x1bc   : > { %v1098_v57 = vadd.f32 -44.0, %v616_v5  ;;  %v609_v41 = vmul.f32 %v597_v46, %v585_v55  ;;  %v578_v42 = vmul.f32 %v572_v12, %v560_v39  ;;  %v1075_v43 = vsel %vm1858_vm7, 1.0, %v1591_v25 }
 0x1bd   : > { %v632_v27 = vmul.f32 1.442695, %v1100_v30  ;;  %v596_v17 = vmul.f32 %v1987_v38, %v590_v22  ;;  %v1077_v8 = vsel %vm1849_vm5, 1.0, %v1591_v25  ;;  %v641_v39 = vmul.f32 7.781132e-20, %v1075_v43 }
 0x1be   : > { %v628_v36 = vmul.f32 1.442695, %v1098_v57  ;;  %v615_v0 = vadd.f32 %v609_v41, %v603_v18  ;;  %v602_v1 = vmul.f32 %v1096_v61, %v578_v42  ;;  %v643_v51 = vmul.f32 7.781132e-20, %v1077_v8 }
 0x1bf   : > { %1348 = vpow2.f32 %v632_v27  ;;  %v608_v7 = vmul.f32 %v596_v17, %v584_v63  ;;  %vm515_vm2 = vcmp.gt.f32.partialorder %v1839_v44, 0.0  ;;  %vm517_vm8 = vcmp.gt.f32.partialorder %v1836_v40, 0.0 }
 0x1c0   : > { %1350 = vpow2.f32 %v628_v36  ;;  %v621_v32 = vmul.f32 24.0, %v615_v0  ;;  %v642_v48 = vmul.f32 7.781132e-20, %v1076_v62  ;;  %v640_v21 = vmul.f32 7.781132e-20, %v1074_v58 }
 0x1c1   : > { %v614_v47 = vadd.f32 %v608_v7, %v602_v1  ;;  %vm516_vm5 = vcmp.gt.f32.partialorder %v1841_v45, 0.0  ;;  %vm514_vm7 = vcmp.gt.f32.partialorder %v1854_v59, 0.0  ;;  %v1079_v2 = vsel %vm1917_vm3, 1.0, %v1591_v25 }
 0x1c2   : > { %v1103_v49 = vadd.f32 -44.0, %v621_v32  ;;  %v1078_v5 = vsel %vm1924_vm6, 1.0, %v1591_v25  ;;  %v645_v18 = vmul.f32 7.781132e-20, %v1079_v2  ;;  %vm2354_vm3 = vnez %v2342_v24 }
 0x1c3   : > { %v620_v10 = vmul.f32 24.0, %v614_v47  ;;  %v644_v19 = vmul.f32 7.781132e-20, %v1078_v5  ;;  %v2110_v43 = vsel %vm514_vm7, 1.0, %v1591_v25  ;;  %v2124_v24 = vsel %vm516_vm5, 1.0, %v1591_v25 }
 0x1c4   : > { %v638_v55 = vmul.f32 1.442695, %v1103_v49  ;;  %v1345_v35 = vpop.eup %1344  ;;  %v2131_v44 = vsel %vm517_vm8, 1.0, %v1591_v25  ;;  %v2138_v59 = vsel %vm518_vm0, 1.0, %v1591_v25  ;;  %vm838_vm12 = vcmask 7168  }
 0x1c5   : > { %v1102_v56 = vadd.f32 -44.0, %v620_v10  ;;  %v1347_v6 = vpop.eup %1346  ;;  %v647_v60 = vsel %vm515_vm2, %v1345_v35, %v641_v39  ;;  %v653_v52 = vsel %vm1891_vm13, %v1345_v35, %v641_v39  ;;  %vm519_vm13 = vcmp.gt.f32.partialorder %v1869_v4, 0.0 }
 0x1c6   : > { %1352 = vpow2.f32 %v638_v55  ;;  %v649_v50 = vsel %vm517_vm8, %v1347_v6, %v643_v51  ;;  %660 = vadd.xlane.f32.xlu0 %v647_v60  ;;  %v655_v23 = vsel %vm2352_vm9, %v1347_v6, %v643_v51  ;;  %v2145_v45 = vsel %vm519_vm13, 1.0, %v1591_v25 }
 0x1c7   : > { %v636_v3 = vmul.f32 1.442695, %v1102_v56  ;;  %664 = vadd.xlane.f32.xlu1 %v649_v50 }
 0x1c9   : > { %v1349_v16 = vpop.eup %1348  ;;  %1354 = vpow2.f32 %v636_v3 }
 0x1ca   : > { %v1351_v61 = vpop.eup %1350  ;;  %v648_v53 = vsel %vm516_vm5, %v1349_v16, %v642_v48  ;;  %690 = vadd.xlane.f32.xlu0 %v653_v52  ;;  %v654_v46 = vsel %vm1902_vm14, %v1349_v16, %v642_v48  ;;  %vm2353_vm14 = vnez %v2344_v28  ;;  %v2115_v28 = vsel %vm515_vm2, 1.0, %v1591_v25 }
 0x1cb   : > { %v652_v54 = vsel %vm1935_vm10, %v1351_v61, %v640_v21  ;;  %v646_v11 = vsel %vm514_vm7, %v1351_v61, %v640_v21  ;;  %662 = vadd.xlane.f32.xlu1 %v648_v53 }
 0x1cc   : > { %v892_v63 = vadd.f32 %v653_v52, %v652_v54  ;;  %v880_v13 = vadd.f32 %v647_v60, %v646_v11 }
 0x1ce   : > { %v881_v12 = vadd.f32 %v880_v13, %v648_v53  ;;  %v893_v30 = vadd.f32 %v892_v63, %v654_v46  ;;  %694 = vadd.xlane.f32.xlu0 %v655_v23 }
 0x1cf   : > { %688 = vadd.xlane.f32.xlu1 %v652_v54 }
 0x1d0   : > { %v1353_v22 = vpop.eup %1352  ;;  %v882_v57 = vadd.f32 %v881_v12, %v649_v50  ;;  %v894_v41 = vadd.f32 %v893_v30, %v655_v23 }
 0x1d1   : > { %v651_v15 = vsel %vm519_vm13, %v1353_v22, %v645_v18  ;;  %v657_v36 = vsel %vm2354_vm3, %v1353_v22, %v645_v18 }
 0x1d2   : > { %658 = vadd.xlane.f32.xlu0 %v646_v11 }
 0x1d3   : > { %v1355_v20 = vpop.eup %1354  ;;  %668 = vadd.xlane.f32.xlu1 %v651_v15 }
 0x1d4   : > { %v650_v9 = vsel %vm518_vm0, %v1355_v20, %v644_v19  ;;  %v656_v42 = vsel %vm2353_vm14, %v1355_v20, %v644_v19 }
 0x1d5   : > { %v883_v27 = vadd.f32 %v882_v57, %v650_v9  ;;  %v895_v17 = vadd.f32 %v894_v41, %v656_v42 }
 0x1d6   : > { %692 = vadd.xlane.f32.xlu0 %v654_v46 }
 0x1d7   : > { %v2103_v0 = vadd.f32 %v883_v27, %v651_v15  ;;  %v2105_v1 = vadd.f32 %v895_v17, %v657_v36  ;;  %666 = vadd.xlane.f32.xlu1 %v650_v9 }
 0x1da   : > { %696 = vadd.xlane.f32.xlu0 %v656_v42 }
 0x1db   : > { %698 = vadd.xlane.f32.xlu1 %v657_v36 }
 0x1de   : > { %778 = vadd.xlane.f32.xlu0 %v2110_v43 }
 0x1df   : > { %780 = vadd.xlane.f32.xlu1 %v2115_v28 }
 0x1e2   : > { %796 = vadd.xlane.f32.xlu0 %v1974_v34 }
 0x1e3   : > { %798 = vadd.xlane.f32.xlu1 %v1962_v29 }
 0x1e6   : > { %782 = vadd.xlane.f32.xlu0 %v2124_v24 }
 0x1e7   : > { %800 = vadd.xlane.f32.xlu1 %v1969_v33 }
 0x1ea   : > { %784 = vadd.xlane.f32.xlu0 %v2131_v44 }
 0x1eb   : > { %802 = vadd.xlane.f32.xlu1 %v1949_v26 }
 0x1ee   : > { %786 = vadd.xlane.f32.xlu0 %v2138_v59 }
 0x1ef   : > { %804 = vadd.xlane.f32.xlu1 %v1987_v38 }
 0x1f2   : > { %788 = vadd.xlane.f32.xlu0 %v2145_v45 }
 0x1f3   : > { %806 = vadd.xlane.f32.xlu1 %v1982_v37 }
 0x253   : > { %v661_v40 = vpop.xlane.xlu0 %660 }
 0x254   : > { %v665_v7 = vpop.xlane.xlu1 %664  ;;  %1356 = vlog2.f32 %v661_v40 }
 0x255   : > { %1358 = vlog2.f32 %v665_v7 }
 0x257   : > { %v691_v14 = vpop.xlane.xlu0 %690 }
 0x258   : > { %v663_v8 = vpop.xlane.xlu1 %662  ;;  %1360 = vlog2.f32 %v691_v14 }
 0x25b   : > { %v695_v32 = vpop.xlane.xlu0 %694 }
 0x25c   : > { %1362 = vlog2.f32 %v695_v32  ;;  %v689_v47 = vpop.xlane.xlu1 %688 }
 0x25d   : > { %1364 = vlog2.f32 %v663_v8 }
 0x25e   : > { %v1357_v39 = vpop.eup %1356  ;;  %1366 = vlog2.f32 %v689_v47 }
 0x25f   : > { %v673_v49 = vmul.f32 0.6931472, %v1357_v39  ;;  %v659_v4 = vpop.xlane.xlu0 %658  ;;  %v1359_v51 = vpop.eup %1358 }
 0x260   : > { %v669_v10 = vpop.xlane.xlu1 %668  ;;  %1368 = vlog2.f32 %v659_v4  ;;  %v677_v58 = vmul.f32 0.6931472, %v1359_v51 }
 0x261   : > { %1370 = vlog2.f32 %v669_v10  ;;  %v683_v55 = vadd.f32 88.0, %v673_v49 }
 0x262   : > { %v1361_v62 = vpop.eup %1360  ;;  %v685_v48 = vadd.f32 88.0, %v677_v58 }
 0x263   : > { %v703_v35 = vmul.f32 0.6931472, %v1361_v62  ;;  %v693_v56 = vpop.xlane.xlu0 %692 }
 0x264   : > { %v667_v6 = vpop.xlane.xlu1 %666  ;;  %1372 = vlog2.f32 %v693_v56 }
 0x265   : > { %v2149_v60 = vadd.f32 %v703_v35, %v683_v55  ;;  %1374 = vlog2.f32 %v667_v6 }
 0x266   : > { %v1363_v50 = vpop.eup %1362 }
 0x267   : > { %v725_v21 = vand.u32 2147483647, %v2149_v60  ;;  %v707_v3 = vmul.f32 0.6931472, %v1363_v50  ;;  %v697_v16 = vpop.xlane.xlu0 %696  ;;  %v1365_v52 = vpop.eup %1364 }
 0x268   : > { %v699_v61 = vpop.xlane.xlu1 %698  ;;  %1376 = vlog2.f32 %v697_v16  ;;  %v1367_v53 = vpop.eup %1366  ;;  %v675_v13 = vmul.f32 0.6931472, %v1365_v52 }
 0x269   : > { %v731_v54 = vsub.f32 0.0, %v725_v21  ;;  %v2152_v11 = vadd.f32 %v707_v3, %v685_v48  ;;  %1378 = vlog2.f32 %v699_v61  ;;  %v701_v19 = vmul.f32 0.6931472, %v1367_v53 }
 0x26a   : > { %v1369_v63 = vpop.eup %1368  ;;  %v684_v15 = vadd.f32 88.0, %v675_v13 }
 0x26b   : > { %v1371_v2 = vpop.eup %1370  ;;  %v738_v5 = vmul.f32 1.442695, %v731_v54  ;;  %v727_v46 = vand.u32 2147483647, %v2152_v11  ;;  %v779_v23 = vpop.xlane.xlu0 %778  ;;  %v671_v12 = vmul.f32 0.6931472, %v1369_v63 }
 0x26c   : > { %v781_v30 = vpop.xlane.xlu1 %780  ;;  %v681_v57 = vmul.f32 0.6931472, %v1371_v2  ;;  %vm790_vm6 = vcmp.gt.f32.partialorder %v779_v23, 0.0 }
 0x26d   : > { %1380 = vpow2.f32 %v738_v5  ;;  %v733_v18 = vsub.f32 0.0, %v727_v46  ;;  %v682_v41 = vadd.f32 88.0, %v671_v12  ;;  %vm791_vm10 = vcmp.gt.f32.partialorder %v781_v30, 0.0 }
 0x26e   : > { %v1373_v22 = vpop.eup %1372  ;;  %v687_v8 = vadd.f32 88.0, %v681_v57 }
 0x26f   : > { %v1375_v20 = vpop.eup %1374  ;;  %v742_v9 = vmul.f32 1.442695, %v733_v18  ;;  %v705_v42 = vmul.f32 0.6931472, %v1373_v22  ;;  %v797_v27 = vpop.xlane.xlu0 %796  ;;  %v2155_v17 = vadd.f32 %v701_v19, %v682_v41 }
 0x270   : > { %v679_v36 = vmul.f32 0.6931472, %v1375_v20  ;;  %v799_v40 = vpop.xlane.xlu1 %798  ;;  %vm808_vm4 = vcmp.gt.f32.partialorder %v797_v27, 0.0 }
 0x271   : > { %1382 = vpow2.f32 %v742_v9  ;;  %v2157_v7 = vadd.f32 %v705_v42, %v684_v15  ;;  %vm809_vm1 = vcmp.gt.f32.partialorder %v799_v40, 0.0  ;;  %vm814_vm15 = vmand %vm790_vm6, %vm808_vm4  ;;  %v724_v32 = vand.u32 2147483647, %v2155_v17 }
 0x272   : > { %v1377_v14 = vpop.eup %1376  ;;  %vm815_vm11 = vmand %vm791_vm10, %vm809_vm1  ;;  %v2162_v47 = vsel %vm814_vm15, 1.0, %v1591_v25  ;;  %v686_v49 = vadd.f32 88.0, %v679_v36  ;;  %vm927_vm1 = vcmp.eq.s32.totalorder %v1828_v31, 4  ;;  %vm915_vm15 = vcmp.eq.s32.totalorder %v1828_v31, 3 }
 0x273   : > { %v1379_v39 = vpop.eup %1378  ;;  %v726_v4 = vand.u32 2147483647, %v2157_v7  ;;  %v709_v51 = vmul.f32 0.6931472, %v1377_v14  ;;  %v2166_v10 = vsel %vm815_vm11, 1.0, %v1591_v25  ;;  %v783_v62 = vpop.xlane.xlu0 %782  ;;  %v730_v58 = vsub.f32 0.0, %v724_v32 }
 0x274   : > { %v711_v55 = vmul.f32 0.6931472, %v1379_v39  ;;  %v860_v35 = vsel %vm838_vm12, %v2166_v10, 0.0  ;;  %v859_v56 = vsel %vm838_vm12, %v2162_v47, 0.0  ;;  %v801_v6 = vpop.xlane.xlu1 %800  ;;  %vm792_vm8 = vcmp.gt.f32.partialorder %v783_v62, 0.0 }
 0x275   : > { %v732_v50 = vsub.f32 0.0, %v726_v4  ;;  %v2172_v48 = vadd.f32 %v709_v51, %v686_v49  ;;  %vm810_vm2 = vcmp.gt.f32.partialorder %v801_v6, 0.0  ;;  %v736_v21 = vmul.f32 1.442695, %v730_v58 }
 0x276   : > { %v2174_v3 = vadd.f32 %v711_v55, %v687_v8  ;;  %v861_v53 = vadd.f32 %v860_v35, %v859_v56  ;;  %vm816_vm5 = vmand %vm792_vm8, %vm810_vm2  ;;  %vm903_vm11 = vcmp.eq.s32.totalorder %v1828_v31, 2  ;;  %vm891_vm2 = vcmp.eq.s32.totalorder %v1828_v31, 1 }
 0x277   : > { %v1381_v16 = vpop.eup %1380  ;;  %v740_v52 = vmul.f32 1.442695, %v732_v50  ;;  %v728_v61 = vand.u32 2147483647, %v2172_v48  ;;  %v785_v54 = vpop.xlane.xlu0 %784  ;;  %1384 = vpow2.f32 %v736_v21  ;;  %v2179_v46 = vsel %vm816_vm5, 1.0, %v1591_v25 }
 0x278   : > { %v729_v63 = vand.u32 2147483647, %v2174_v3  ;;  %v749_v2 = vadd.f32 1.0, %v1381_v16  ;;  %v803_v13 = vpop.xlane.xlu1 %802  ;;  %v862_v12 = vsel %vm838_vm12, %v2179_v46, 0.0  ;;  %vm793_vm9 = vcmp.gt.f32.partialorder %v785_v54, 0.0 }
 0x279   : > { %1386 = vpow2.f32 %v740_v52  ;;  %v734_v5 = vsub.f32 0.0, %v728_v61  ;;  %vm811_vm7 = vcmp.gt.f32.partialorder %v803_v13, 0.0  ;;  %v863_v22 = vadd.f32 %v862_v12, %v861_v53 }
 0x27a   : > { %v735_v23 = vsub.f32 0.0, %v729_v63  ;;  %1388 = vlog2.f32 %v749_v2  ;;  %vm817_vm13 = vmand %vm793_vm9, %vm811_vm7  ;;  %v719_v52 = vmax.f32 %v2149_v60, 0.0  ;;  %v721_v53 = vmax.f32 %v2152_v11, 0.0 }
 0x27b   : > { %v1383_v30 = vpop.eup %1382  ;;  %v744_v18 = vmul.f32 1.442695, %v734_v5  ;;  %v787_v19 = vpop.xlane.xlu0 %786  ;;  %v2184_v20 = vsel %vm817_vm13, 1.0, %v1591_v25  ;;  %v718_v2 = vmax.f32 %v2155_v17, 0.0  ;;  %v720_v12 = vmax.f32 %v2157_v7, 0.0 }
 0x27c   : > { %v746_v57 = vmul.f32 1.442695, %v735_v23  ;;  %v751_v41 = vadd.f32 1.0, %v1383_v30  ;;  %v805_v15 = vpop.xlane.xlu1 %804  ;;  %vm794_vm0 = vcmp.gt.f32.partialorder %v787_v19, 0.0  ;;  %v864_v9 = vsel %vm838_vm12, %v2184_v20, 0.0 }
 0x27d   : > { %1390 = vpow2.f32 %v744_v18  ;;  %vm812_vm14 = vcmp.gt.f32.partialorder %v805_v15, 0.0  ;;  %v865_v42 = vadd.f32 %v864_v9, %v863_v22  ;;  %v722_v11 = vmax.f32 %v2172_v48, 0.0 }
 0x27e   : > { %1392 = vpow2.f32 %v746_v57  ;;  %vm818_vm3 = vmand %vm794_vm0, %vm812_vm14  ;;  %v723_v17 = vmax.f32 %v2174_v3, 0.0  ;;  %vm879_vm8 = vcmp.eq.s32.totalorder %v1828_v31, 0 }
 0x27f   : > { %1394 = vlog2.f32 %v751_v41  ;;  %v2189_v27 = vsel %vm818_vm3, 1.0, %v1591_v25  ;;  %v789_v36 = vpop.xlane.xlu0 %788 }
 0x280   : > { %v866_v40 = vsel %vm838_vm12, %v2189_v27, 0.0  ;;  %v807_v14 = vpop.xlane.xlu1 %806  ;;  %vm795_vm6 = vcmp.gt.f32.partialorder %v789_v36, 0.0 }
 0x281   : > { %vm813_vm10 = vcmp.gt.f32.partialorder %v807_v14, 0.0  ;;  %v867_v8 = vadd.f32 %v866_v40, %v865_v42  ;;  %v1385_v32 = vpop.eup %1384 }
 0x282   : > { %vm819_vm4 = vmand %vm795_vm6, %vm813_vm10  ;;  %v748_v49 = vadd.f32 1.0, %v1385_v32 }
 0x283   : > { %v1387_v39 = vpop.eup %1386  ;;  %v1109_v4 = vsel %vm819_vm4, 1.0, %v1591_v25 }
 0x284   : > { %v750_v51 = vadd.f32 1.0, %v1387_v39  ;;  %v868_v62 = vsel %vm838_vm12, %v1109_v4, 0.0  ;;  %v1389_v58 = vpop.eup %1388  ;;  %1396 = vlog2.f32 %v748_v49 }
 0x285   : > { %v869_v55 = vadd.f32 %v868_v62, %v867_v8  ;;  %v757_v6 = vmul.f32 0.6931472, %v1389_v58 }
 0x286   : > { %1398 = vlog2.f32 %v750_v51 }
 0x287   : > { %v1391_v35 = vpop.eup %1390  ;;  %870 = vadd.xlane.f32.xlu1 %v869_v55  ;;  %v767_v61 = vadd.f32 %v757_v6, %v719_v52 }
 0x288   : > { %v1393_v56 = vpop.eup %1392  ;;  %v752_v50 = vadd.f32 1.0, %v1391_v35 }
 0x289   : > { %v1395_v21 = vpop.eup %1394  ;;  %v753_v16 = vadd.f32 1.0, %v1393_v56  ;;  %v773_v13 = vmul.f32 0.041666668, %v767_v61 }
 0x28a   : > { %1400 = vlog2.f32 %v752_v50  ;;  %v761_v25 = vmul.f32 0.6931472, %v1395_v21 }
 0x28b   : > { %1402 = vlog2.f32 %v753_v16  ;;  %v833_v60 = vmul.f32 %v2166_v10, %v773_v13 }
 0x28c   : > { %v769_v23 = vadd.f32 %v761_v25, %v721_v53 }
 0x28d   : > { %v840_v8 = vsel %vm838_vm12, %v833_v60, 0.0 }
 0x28e   : > { %v1397_v54 = vpop.eup %1396  ;;  %v775_v41 = vmul.f32 0.041666668, %v769_v23  ;;  %v916_v23 = vadd.f32 %v1962_v29, %v1974_v34 }
 0x28f   : > { %v755_v5 = vmul.f32 0.6931472, %v1397_v54 }
 0x290   : > { %v1399_v63 = vpop.eup %1398  ;;  %v835_v10 = vmul.f32 %v2184_v20, %v775_v41 }
 0x291   : > { %v759_v30 = vmul.f32 0.6931472, %v1399_v63  ;;  %v766_v18 = vadd.f32 %v755_v5, %v718_v2 }
 0x293   : > { %v768_v22 = vadd.f32 %v759_v30, %v720_v12  ;;  %v772_v57 = vmul.f32 0.041666668, %v766_v18  ;;  %v904_v12 = vadd.f32 %v2115_v28, %v2110_v43  ;;  %v917_v30 = vadd.f32 %v1969_v33, %v916_v23 }
 0x294   : > { %v1401_v19 = vpop.eup %1400  ;;  %v897_v43 = vrot.slane %v2105_v1, 4  ;;  %v885_v33 = vrot.slane %v2103_v0, 4 }
 0x295   : > { %v1403_v15 = vpop.eup %1402  ;;  %v774_v9 = vmul.f32 0.041666668, %v768_v22  ;;  %v763_v42 = vmul.f32 0.6931472, %v1401_v19  ;;  %v832_v36 = vmul.f32 %v2162_v47, %v772_v57  ;;  %v844_v47 = vsel %vm838_vm12, %v835_v10, 0.0 }
 0x296   : > { %v765_v40 = vmul.f32 0.6931472, %v1403_v15  ;;  %v905_v18 = vadd.f32 %v2124_v24, %v904_v12  ;;  %v918_v22 = vadd.f32 %v1949_v26, %v917_v30  ;;  %v898_v26 = vadd.f32 %v897_v43, %v2105_v1 }
 0x297   : > { %v834_v7 = vmul.f32 %v2179_v46, %v774_v9  ;;  %v770_v14 = vadd.f32 %v763_v42, %v722_v11  ;;  %v839_v32 = vsel %vm838_vm12, %v832_v36, 0.0 }
 0x298   : > { %v771_v39 = vadd.f32 %v765_v40, %v723_v17  ;;  %v841_v49 = vadd.f32 %v840_v8, %v839_v32  ;;  %v906_v19 = vadd.f32 %v2131_v44, %v905_v18  ;;  %v919_v60 = vadd.f32 %v1987_v38, %v918_v22 }
 0x299   : > { %v842_v48 = vsel %vm838_vm12, %v834_v7, 0.0  ;;  %v776_v51 = vmul.f32 0.041666668, %v770_v14  ;;  %v886_v38 = vadd.f32 %v885_v33, %v2103_v0 }
 0x29a   : > { %v777_v62 = vmul.f32 0.041666668, %v771_v39  ;;  %v843_v58 = vadd.f32 %v842_v48, %v841_v49  ;;  %v907_v57 = vadd.f32 %v2138_v59, %v906_v19  ;;  %v920_v41 = vadd.f32 %v1982_v37, %v919_v60 }
 0x29b   : > { %v836_v3 = vmul.f32 %v2189_v27, %v776_v51  ;;  %v899_v59 = vrot.slane %v898_v26, 2  ;;  %v887_v37 = vrot.slane %v886_v38, 2 }
 0x29c   : > { %v837_v55 = vmul.f32 %v1109_v4, %v777_v62  ;;  %v845_v46 = vadd.f32 %v844_v47, %v843_v58  ;;  %v908_v15 = vadd.f32 %v2145_v45, %v907_v57  ;;  %v921_v29 = vrot.slane %v920_v41, 4 }
 0x29d   : > { %v846_v35 = vsel %vm838_vm12, %v836_v3, 0.0  ;;  %v900_v45 = vadd.f32 %v899_v59, %v898_v26  ;;  %v888_v36 = vadd.f32 %v887_v37, %v886_v38 }
 0x29e   : > { %v847_v56 = vadd.f32 %v846_v35, %v845_v46  ;;  %v848_v6 = vsel %vm838_vm12, %v837_v55, 0.0  ;;  %v909_v34 = vrot.slane %v908_v15, 4  ;;  %v922_v28 = vadd.f32 %v921_v29, %v920_v41 }
 0x29f   : > { %vm928_vm12 = vcmp.eq.s32.totalorder %v1828_v31, 5  ;;  %v901_v7 = vrot.slane %v900_v45, 1  ;;  %v889_v0 = vrot.slane %v888_v36, 1 }
 0x2a0   : > { %v849_v50 = vadd.f32 %v848_v6, %v847_v56  ;;  %v910_v24 = vadd.f32 %v909_v34, %v908_v15  ;;  %v923_v44 = vrot.slane %v922_v28, 2 }
 0x2a1   : > { %v902_v49 = vadd.f32 %v901_v7, %v900_v45  ;;  %v890_v51 = vadd.f32 %v889_v0, %v888_v36 }
 0x2a2   : > { %850 = vadd.xlane.f32.xlu0 %v849_v50  ;;  %v911_v11 = vrot.slane %v910_v24, 2  ;;  %v924_v9 = vadd.f32 %v923_v44, %v922_v28 }
 0x2a4   : > { %v912_v42 = vadd.f32 %v911_v11, %v910_v24  ;;  %v925_v17 = vrot.slane %v924_v9, 1 }
 0x2a6   : > { %v913_v40 = vrot.slane %v912_v42, 1  ;;  %v926_v1 = vadd.f32 %v925_v17, %v924_v9 }
 0x2a8   : > { %v914_v8 = vadd.f32 %v913_v40, %v912_v42 }
 0x314   : > { %v871_v20 = vpop.xlane.xlu1 %870 }
 0x315   : > { %v872_v21 = vrot.slane %v871_v20, 4 }
 0x317   : > { %v873_v16 = vadd.f32 %v872_v21, %v871_v20 }
 0x319   : > { %v874_v52 = vrot.slane %v873_v16, 2 }
 0x31b   : > { %v875_v54 = vadd.f32 %v874_v52, %v873_v16 }
 0x31d   : > { %v876_v2 = vrot.slane %v875_v54, 1 }
 0x31f   : > { %v877_v5 = vadd.f32 %v876_v2, %v875_v54 }
 0x32f   : > { %v851_v61 = vpop.xlane.xlu0 %850 }
 0x330   : > { %v852_v25 = vrot.slane %v851_v61, 4 }
 0x332   : > { %v853_v53 = vadd.f32 %v852_v25, %v851_v61 }
 0x334   : > { %v854_v27 = vrot.slane %v853_v53, 2 }
 0x336   : > { %v855_v63 = vadd.f32 %v854_v27, %v853_v53 }
 0x338   : > { %v856_v4 = vrot.slane %v855_v63, 1 }
 0x33a   : > { %v857_v13 = vadd.f32 %v856_v4, %v855_v63 }
 0x33c   : > { %1245 = vpush %v857_v13 }
 0x33d   : > { %1247 = vpush %v877_v5 }
 0x36d   : > { %s1246_s7 = spop %1245 }
 0x36e   : > { %v931_v14 = vstv %s1246_s7  ;;  %s1248_s20 = spop %1247 }
 0x36f   : > { %v929_v32 = vstv %s1248_s20 }
 0x370   : > { %v930_v10 = vsel %vm928_vm12, %v929_v32, 0.0 }
 0x371   : > { %v932_v39 = vsel %vm927_vm1, %v931_v14, %v930_v10 }
 0x372   : > { %v933_v48 = vsel %vm915_vm15, %v926_v1, %v932_v39 }
 0x373   : > { %v934_v62 = vsel %vm903_vm11, %v914_v8, %v933_v48 }
 0x374   : > { %v935_v58 = vsel %vm891_vm2, %v902_v49, %v934_v62 }
 0x375   : > { %v936_v3 = vsel %vm879_vm8, %v890_v51, %v935_v58 }
 0x376   : > { %939 = vst [vmem:[%s258_s10] sm:$0xff] %v936_v3 }
 0x377   : > { %1505 = shalt.err (!%p1502_p8)
}
 0x378   : > { %s1506_s11 = scalar_lea.hbm %s2239_s27, 128  ;;  %s1510_s6 = scalar_lea.hbm %s2291_s3, 256 }
 0x379   : > { %p1507_p10 = scmp.ne.s32.totalorder %s2239_s27, %s1506_s11  ;;  %p1511_p4 = scmp.lt.u32.totalorder %s2239_s27, %s2291_s3 }
 0x37a   : > { %p1512_p11 = scmp.lt.u32.totalorder %s1510_s6, %s1506_s11  ;;  %p1514_p3 = scmp.lt.u32.totalorder %s1506_s11, %s2239_s27 }
 0x37b   : > { %p1508_p13 = pnand %p1507_p10, %p2355_p5 }
 0x37c   : > { %p1513_p2 = por %p1512_p11, %p1511_p4 }
 0x37d   : > { %p1509_p7 = pneg %p1508_p13 }
 0x37e   : > { %p1515_p1 = por %p1514_p3, %p1513_p2 }
 0x380   : > { %p1516_p12 = pnand %p1515_p1, %p1509_p7 }
 0x382   : > { %1519 = shalt.err (!%p1516_p12)
}
 0x383   : > { %1257 = dma.vmem_to_hbm [thread:$0]  (%p2355_p5), %s2241_s25, 128, %s2239_s27, %s941_s19  }
 0x384 PF: > { %s966_s8 = sand.u32 1, %s1562_s12   ;;  %p2356_p0 = scmp.ne.s32.totalorder %s2309_s5, 0 }
 0x385   : > { %p2357_p9 = scmp.ge.s32.totalorder %s1582_s17, 2  ;;  %s967_s20 = scalar_lea.sflag [#allocation4], %s966_s8 }
 0x387   : > { %p1271_p6 = pnand %p2357_p9, %p2356_p0 }
 0x389   : > { %1557 = dma.done.wait (!%p1271_p6), %s967_s20, 128  }
 0x38a   : > { %1559 = vsyncadd (!%p1271_p6), %s967_s20, 4294967168  ;;  %s20_s17 = sadd.s32 1, %s1582_s17   ;;  %s2358_s12 = smov %s1566_s13 }
 0x38b   : > { %p17_p8 = scmp.ge.s32.totalorder %s20_s17, 4   ;;  %s2359_s13 = smov %s1570_s14 }
 0x38c   : > { %s2360_s14 = smov %s1660_s23  ;;  %s2361_s15 = smov %s1578_s16 }
 0x38d   : > { %s2362_s16 = smov %s2364_s18  ;;  %19 = sbr.rel (!%p17_p8) target bundleno = 9 (0x9), region = 96 }
 0x394   :  { %972 = vsyncpa [#allocation3], 1 }
 0x395   :  { %974 = vsyncpa [#allocation3 + $0x1], 1 }
 0x396   :  { %975 = vsyncpa [#allocation6], 1 }
 0x397   :  { %976 = vsyncpa [#allocation4], 1 }
 0x398   :  { %978 = vsyncpa [#allocation4 + $0x1], 1 }

</bundles_post_ra>
